<compile_context>
chip_gen: v6e
topology: v6e:2x2x1
jax: 0.10.0
libtpu: 0.0.40
codegen_flags: <defaults>
</compile_context>

<pallas_src>
import functools

import jax
import jax.numpy as jnp
from jax.experimental import pallas as pl
from jax.experimental.pallas import tpu as pltpu

LANE = 128   # TPU lane width; every channel dim is padded to a multiple of it
PADP = 8     # zero-border rows in the f32 shift buffer (only +-1 shifts needed)


def _round_up(v, m):
    return (v + m - 1) // m * m


def bottleneck_kernel(H, W, PADV, x_ref, w1_ref, w2_ref, wfc1_ref, wfc2_ref,
                      w3_ref, bias_ref, out_ref, pad_ref, col_ref):
    """One grid step == one batch element."""
    HW = H * W
    Cm = w1_ref.shape[-1]      # padded group_width (mid channels)
    Ci = wfc1_ref.shape[-1]    # padded attention-bottleneck channels
    Co = w3_ref.shape[-1]      # padded output channels

    # ---- conv1 (1x1) + bn1 (scale folded into w1 host-side) + relu --------
    h = jnp.dot(x_ref[...].astype(jnp.bfloat16), w1_ref[...],
                preferred_element_type=jnp.float32)
    h = jnp.maximum(h + bias_ref[0:1, :Cm], 0.0)             # (HW, Cm) f32

    # ---- conv2 (SplAtConv2d 3x3, stride 1, pad 1): 3-tap im2col ------------
    # col row (PADV + p) holds the three horizontal taps
    #   [ h[p-1]*mask_l | h[p] | h[p+1]*mask_r ]     (bf16, 128-lane blocks)
    # and PADV zero rows above/below supply the vertical conv padding.  The
    # +-1 shifts come from a small f32 buffer so the masking stays in f32.
    pad_ref[0:PADP, :] = jnp.zeros((PADP, Cm), jnp.float32)
    pad_ref[PADP + HW:, :] = jnp.zeros((PADP, Cm), jnp.float32)
    pad_ref[PADP:PADP + HW, :] = h

    xx = jax.lax.broadcasted_iota(jnp.int32, (HW, 1), 0) % W   # column index
    mask_l = xx >= 1          # left neighbour exists inside the image row
    mask_r = xx <= W - 2      # right neighbour exists inside the image row

    zcol = jnp.zeros((PADV, 3 * Cm), jnp.bfloat16)
    col_ref[0:PADV, :] = zcol                   # rows above the image
    col_ref[PADV + HW:, :] = zcol               # rows below the image
    wl = jnp.where(mask_l, pad_ref[PADP - 1:PADP - 1 + HW, :], 0.0)
    wr = jnp.where(mask_r, pad_ref[PADP + 1:PADP + 1 + HW, :], 0.0)
    col_ref[PADV:PADV + HW, 0:Cm] = wl.astype(jnp.bfloat16)
    col_ref[PADV:PADV + HW, Cm:2 * Cm] = h.astype(jnp.bfloat16)
    col_ref[PADV:PADV + HW, 2 * Cm:3 * Cm] = wr.astype(jnp.bfloat16)

    # Three accumulated matmuls over the vertical taps, K = 3*Cm each.  The
    # MXU operand is the whole (tile-aligned) col buffer; the +-W row shift
    # per vertical tap is applied to the f32 result with vreg-aligned slices.
    t0 = jnp.dot(col_ref[...], w2_ref[0], preferred_element_type=jnp.float32)
    t1 = jnp.dot(col_ref[...], w2_ref[1], preferred_element_type=jnp.float32)
    t2 = jnp.dot(col_ref[...], w2_ref[2], preferred_element_type=jnp.float32)
    acc = (t0[PADV - W:PADV - W + HW]
           + t1[PADV:PADV + HW]
           + t2[PADV + W:PADV + W + HW])
    h2 = jnp.maximum(acc + bias_ref[1:2, :Cm], 0.0)          # bn0 + relu

    # ---- split attention, radix=1: GAP -> fc1+bn+relu -> fc2 -> sigmoid ---
    gap = jnp.mean(h2, axis=0, keepdims=True)                # (1, Cm)
    a = jnp.dot(gap.astype(jnp.bfloat16), wfc1_ref[...],
                preferred_element_type=jnp.float32) + bias_ref[2:3, :Ci]
    a = jnp.maximum(a, 0.0)
    a = jnp.dot(a.astype(jnp.bfloat16), wfc2_ref[...],
                preferred_element_type=jnp.float32) + bias_ref[3:4, :Cm]
    atten = jax.nn.sigmoid(a)                                # rSoftMax, radix=1
    h2 = h2 * atten                                          # channel-wise scale

    # ---- conv3 (1x1) + bn3 (folded) + residual + relu ----------------------
    y = jnp.dot(h2.astype(jnp.bfloat16), w3_ref[...],
                preferred_element_type=jnp.float32) + bias_ref[4:5, :Co]
    out_ref[...] = jnp.maximum(y + x_ref[...], 0.0)          # downsample=None


def _pad2(a, rows, cols):
    return jnp.pad(a, ((0, rows - a.shape[0]), (0, cols - a.shape[1])))


def bottleneck_forward(x_nhwc, params):
    (w1, s1, o1, w2, s2, o2, wfc1, bfc1, sa, oa, wfc2, bfc2, w3, s3, o3) = params
    N, H, W, cin = x_nhwc.shape
    cmid = w1.shape[1]
    inter = wfc1.shape[1]
    cout = w3.shape[1]
    HW = H * W
    assert cin == cout, "downsample=None requires inplanes == planes*expansion"
    assert HW % 8 == 0, "flattened spatial extent must be sublane aligned"

    # Per-tensor padded channel widths (feedback: no common max padding).
    cin_p = _round_up(cin, LANE)
    cmid_p = _round_up(cmid, LANE)
    inter_p = _round_up(inter, LANE)
    cout_p = _round_up(cout, LANE)
    maxp = max(cmid_p, inter_p, cout_p)
    PADV = _round_up(max(W, 16), 16)     # >= W and bf16-tile aligned

    # Fold the (inference-mode) BatchNorm scales into the conv / fc weights so
    # only a bias-add + relu remains in the kernel epilogues (done in f32,
    # single cast to bf16 afterwards).
    w1f = w1 * s1                         # conv1 <- bn1 scale
    w2f = w2 * s2                         # 3x3 conv <- bn0 scale (out channel)
    wfc1f = wfc1 * sa                     # fc1 <- attention bn scale
    bfc1f = bfc1 * sa + oa
    w3f = w3 * s3                         # conv3 <- bn3 scale

    w1p = _pad2(w1f, cin_p, cmid_p).astype(jnp.bfloat16)
    # 3x3 weight stacked per vertical tap ky, horizontal taps along K:
    #   w2p[ky, kx*cmid_p + ci, co] = w2[ky*3+kx, ci, co]
    w2p = jnp.zeros((3, 3 * cmid_p, cmid_p), jnp.float32)
    for ky in range(3):
        for kx in range(3):
            w2p = w2p.at[ky, kx * cmid_p:kx * cmid_p + cmid, :cmid].set(
                w2f[ky * 3 + kx])
    w2p = w2p.astype(jnp.bfloat16)
    wfc1p = _pad2(wfc1f, cmid_p, inter_p).astype(jnp.bfloat16)
    wfc2p = _pad2(wfc2, inter_p, cmid_p).astype(jnp.bfloat16)
    w3p = _pad2(w3f, cmid_p, cout_p).astype(jnp.bfloat16)

    # All five tiny bias vectors packed into one lane-aligned (8, maxp) array.
    bias = jnp.zeros((8, maxp), jnp.float32)
    bias = bias.at[0, :cmid].set(o1[0])       # bn1 offset
    bias = bias.at[1, :cmid].set(o2[0])       # bn0 offset
    bias = bias.at[2, :inter].set(bfc1f[0])   # fc1 bias (bn folded)
    bias = bias.at[3, :cmid].set(bfc2[0])     # fc2 bias
    bias = bias.at[4, :cout].set(o3[0])       # bn3 offset

    xp = jnp.pad(x_nhwc.reshape(N, HW, cin), ((0, 0), (0, 0), (0, cin_p - cin)))

    kernel = functools.partial(bottleneck_kernel, H, W, PADV)

    flops = N * (2 * HW * cin_p * cmid_p
                 + 2 * 3 * (HW + 2 * PADV) * (3 * cmid_p) * cmid_p
                 + 2 * (cmid_p * inter_p + inter_p * cmid_p)
                 + 2 * HW * cmid_p * cout_p)
    bytes_accessed = (4 * N * HW * (cin_p + cout_p)
                      + 2 * (cin_p * cmid_p + 9 * cmid_p * cmid_p
                             + cmid_p * inter_p + inter_p * cmid_p
                             + cmid_p * cout_p)
                      + 4 * 8 * maxp)

    out = pl.pallas_call(
        kernel,
        out_shape=jax.ShapeDtypeStruct((N, HW, cout_p), jnp.float32),
        grid=(N,),
        in_specs=[
            pl.BlockSpec((None, HW, cin_p), lambda n: (n, 0, 0)),    # x (per batch)
            pl.BlockSpec((cin_p, cmid_p), lambda n: (0, 0)),         # w1 (bn1 folded)
            pl.BlockSpec((3, 3 * cmid_p, cmid_p), lambda n: (0, 0, 0)),  # w2 per-ky
            pl.BlockSpec((cmid_p, inter_p), lambda n: (0, 0)),       # fc1 (bn folded)
            pl.BlockSpec((inter_p, cmid_p), lambda n: (0, 0)),       # fc2
            pl.BlockSpec((cmid_p, cout_p), lambda n: (0, 0)),        # w3 (bn3 folded)
            pl.BlockSpec((8, maxp), lambda n: (0, 0)),               # packed biases
        ],
        out_specs=pl.BlockSpec((None, HW, cout_p), lambda n: (n, 0, 0)),
        scratch_shapes=[
            pltpu.VMEM((HW + 2 * PADP, cmid_p), jnp.float32),        # +-1 shift buf
            pltpu.VMEM((HW + 2 * PADV, 3 * cmid_p), jnp.bfloat16),   # 3-tap im2col
        ],
        compiler_params=pltpu.CompilerParams(
            dimension_semantics=("parallel",),       # batch across TensorCores
            vmem_limit_bytes=64 * 1024 * 1024),
        cost_estimate=pl.CostEstimate(
            flops=flops,
            transcendentals=N * cmid_p,
            bytes_accessed=bytes_accessed),
    )(xp, w1p, w2p, wfc1p, wfc2p, w3p, bias)

    return out[:, :, :cout].reshape(N, H, W, cout)


def reference(x_nhwc, params):
    """Pure-JAX f32 reference of the same forward (correctness check)."""
    (w1, s1, o1, w2, s2, o2, wfc1, bfc1, sa, oa, wfc2, bfc2, w3, s3, o3) = params
    N, H, W, cin = x_nhwc.shape
    cmid = w1.shape[1]
    x = x_nhwc.reshape(N, H * W, cin)
    h = jnp.maximum(jnp.einsum('npc,cd->npd', x, w1) * s1 + o1, 0.0)
    hp = jnp.pad(h.reshape(N, H, W, cmid), ((0, 0), (1, 1), (1, 1), (0, 0)))
    acc = jnp.zeros((N, H, W, cmid), jnp.float32)
    for ky in range(3):
        for kx in range(3):
            acc = acc + jnp.einsum('nhwc,cd->nhwd',
                                   hp[:, ky:ky + H, kx:kx + W, :],
                                   w2[ky * 3 + kx])
    h2 = jnp.maximum(acc.reshape(N, H * W, cmid) * s2 + o2, 0.0)
    gap = h2.mean(axis=1)
    a = jnp.maximum((gap @ wfc1 + bfc1) * sa + oa, 0.0)
    atten = jax.nn.sigmoid(a @ wfc2 + bfc2)
    h2 = h2 * atten[:, None, :]
    y = jnp.einsum('npc,cd->npd', h2, w3) * s3 + o3
    return jnp.maximum(y + x, 0.0).reshape(N, H, W, -1)


def fold_bn(gamma, beta, mean, var, eps=1e-5):
    scale = gamma / jnp.sqrt(var + eps)
    offset = beta - mean * scale
    return scale[None, :], offset[None, :]


if __name__ == "__main__":
    key = jax.random.PRNGKey(0)

    # Small shapes consistent with the module (downsample=None requires
    # inplanes == planes * expansion).
    N, H, W = 2, 8, 8
    inplanes, planes = 32, 8
    cardinality, bottleneck_width, radix = 1, 64, 1
    group_width = int(planes * (bottleneck_width / 64.0)) * cardinality   # 8
    cout = planes * 4                                                     # 32
    inter = max(group_width * radix // 4, 32)                             # 32

    ks = jax.random.split(key, 16)

    def nrm(k, shape, s=0.1):
        return s * jax.random.normal(k, shape, jnp.float32)

    def bn_params(k, c):
        k1, k2, k3, k4 = jax.random.split(k, 4)
        gamma = 1.0 + 0.1 * jax.random.normal(k1, (c,), jnp.float32)
        beta = 0.1 * jax.random.normal(k2, (c,), jnp.float32)
        mean = 0.1 * jax.random.normal(k3, (c,), jnp.float32)
        var = 0.5 + jax.random.uniform(k4, (c,), jnp.float32)
        return fold_bn(gamma, beta, mean, var)

    x = jax.random.normal(ks[0], (N, H, W, inplanes), jnp.float32)

    w1 = nrm(ks[1], (inplanes, group_width))            # conv1 1x1 (no bias)
    s1, o1 = bn_params(ks[2], group_width)              # bn1
    w2 = nrm(ks[3], (9, group_width, group_width))      # SplAt conv 3x3 (no bias)
    s2, o2 = bn_params(ks[4], group_width)              # SplAt bn0
    wfc1 = nrm(ks[5], (group_width, inter))             # SplAt fc1 (1x1, bias)
    bfc1 = nrm(ks[6], (1, inter))
    sa, oa = bn_params(ks[7], inter)                    # SplAt bn1
    wfc2 = nrm(ks[8], (inter, group_width))             # SplAt fc2 (1x1, bias)
    bfc2 = nrm(ks[9], (1, group_width))
    w3 = nrm(ks[10], (group_width, cout))               # conv3 1x1 (no bias)
    s3, o3 = bn_params(ks[11], cout)                    # bn3

    params = (w1, s1, o1, w2, s2, o2, wfc1, bfc1, sa, oa, wfc2, bfc2,
              w3, s3, o3)

    out = bottleneck_forward(x, params)
    out = jax.block_until_ready(out)

    ref = reference(x, params)
    err = float(jnp.max(jnp.abs(out - ref)))
    # bf16 MXU operands with f32 accumulation -> loosened tolerance.
    assert jnp.allclose(out, ref, rtol=5e-2, atol=5e-2), f"max abs err {err}"

    print("KERNEL_OK")
</pallas_src>

<mosaic_0001>
module attributes {stable_mosaic.version = 11 : i64} {
  func.func @bottleneck_kernel(%arg0: i32, %arg1: memref<1x64x128xf32, #tpu.memory_space<vmem>>, %arg2: memref<128x128xbf16, #tpu.memory_space<vmem>>, %arg3: memref<3x384x128xbf16, #tpu.memory_space<vmem>>, %arg4: memref<128x128xbf16, #tpu.memory_space<vmem>>, %arg5: memref<128x128xbf16, #tpu.memory_space<vmem>>, %arg6: memref<128x128xbf16, #tpu.memory_space<vmem>>, %arg7: memref<8x128xf32, #tpu.memory_space<vmem>>, %arg8: memref<1x64x128xf32, #tpu.memory_space<vmem>>, %arg9: memref<80x128xf32, #tpu.memory_space<vmem>>, %arg10: memref<96x384xbf16, #tpu.memory_space<vmem>>) attributes {dimension_semantics = [#tpu.dimension_semantics<parallel>], iteration_bounds = array<i64: 2>, scalar_prefetch = 0 : i64, scratch_operands = 2 : i64, tpu.core_type = #tpu.core_type<tc>, window_params = [{transform_indices = @transform_0, window_bounds = array<i64: 1, 64, 128>}, {pipeline_mode = #tpu.pipeline_mode<synchronous>, transform_indices = @transform_1, window_bounds = array<i64: 128, 128>}, {pipeline_mode = #tpu.pipeline_mode<synchronous>, transform_indices = @transform_2, window_bounds = array<i64: 3, 384, 128>}, {pipeline_mode = #tpu.pipeline_mode<synchronous>, transform_indices = @transform_3, window_bounds = array<i64: 128, 128>}, {pipeline_mode = #tpu.pipeline_mode<synchronous>, transform_indices = @transform_4, window_bounds = array<i64: 128, 128>}, {pipeline_mode = #tpu.pipeline_mode<synchronous>, transform_indices = @transform_5, window_bounds = array<i64: 128, 128>}, {pipeline_mode = #tpu.pipeline_mode<synchronous>, transform_indices = @transform_6, window_bounds = array<i64: 8, 128>}, {transform_indices = @transform_7, window_bounds = array<i64: 1, 64, 128>}]} {
    %c0 = arith.constant 0 : index
    %c0_0 = arith.constant 0 : index
    %c0_1 = arith.constant 0 : index
    %0 = vector.load %arg1[%c0, %c0_0, %c0_1] : memref<1x64x128xf32, #tpu.memory_space<vmem>>, vector<1x64x128xf32>
    %1 = vector.shape_cast %0 : vector<1x64x128xf32> to vector<64x128xf32>
    %2 = arith.truncf %1 : vector<64x128xf32> to vector<64x128xbf16>
    %c0_2 = arith.constant 0 : index
    %c0_3 = arith.constant 0 : index
    %3 = vector.load %arg2[%c0_2, %c0_3] : memref<128x128xbf16, #tpu.memory_space<vmem>>, vector<128x128xbf16>
    %cst = arith.constant dense<0.000000e+00> : vector<64x128xf32>
    %4 = tpu.matmul %2, %3, %cst {dimension_numbers = #tpu.dot_dimension_numbers<[1], [0], [0], [1], [0, 0, 1, 1], [], []>} : vector<64x128xbf16>, vector<128x128xbf16>, vector<64x128xf32> -> vector<64x128xf32>
    %c0_4 = arith.constant 0 : index
    %c0_5 = arith.constant 0 : index
    %5 = vector.load %arg7[%c0_4, %c0_5] : memref<8x128xf32, #tpu.memory_space<vmem>>, vector<1x128xf32>
    %6 = vector.broadcast %5 : vector<1x128xf32> to vector<64x128xf32>
    %7 = arith.addf %4, %6 : vector<64x128xf32>
    %cst_6 = arith.constant 0.000000e+00 : f32
    %8 = vector.broadcast %cst_6 : f32 to vector<64x128xf32>
    %9 = arith.maximumf %7, %8 : vector<64x128xf32>
    %cst_7 = arith.constant 0.000000e+00 : f32
    %10 = vector.broadcast %cst_7 : f32 to vector<8x128xf32>
    %c0_8 = arith.constant 0 : index
    %c0_9 = arith.constant 0 : index
    %11 = vector.load %arg9[%c0_8, %c0_9] : memref<80x128xf32, #tpu.memory_space<vmem>>, vector<8x128xf32>
    tpu.vector_store %arg9[%c0_8, %c0_9], %10 {strides = array<i32>} : memref<80x128xf32, #tpu.memory_space<vmem>>, vector<8x128xf32>,
    %cst_10 = arith.constant 0.000000e+00 : f32
    %12 = vector.broadcast %cst_10 : f32 to vector<8x128xf32>
    %c72 = arith.constant 72 : index
    %c0_11 = arith.constant 0 : index
    %13 = vector.load %arg9[%c72, %c0_11] : memref<80x128xf32, #tpu.memory_space<vmem>>, vector<8x128xf32>
    tpu.vector_store %arg9[%c72, %c0_11], %12 {strides = array<i32>} : memref<80x128xf32, #tpu.memory_space<vmem>>, vector<8x128xf32>,
    %c8 = arith.constant 8 : index
    %c0_12 = arith.constant 0 : index
    %14 = vector.load %arg9[%c8, %c0_12] : memref<80x128xf32, #tpu.memory_space<vmem>>, vector<64x128xf32>
    tpu.vector_store %arg9[%c8, %c0_12], %9 {strides = array<i32>} : memref<80x128xf32, #tpu.memory_space<vmem>>, vector<64x128xf32>,
    %15 = tpu.iota {dimensions = array<i32: 0>} : vector<64x1xi32>
    %c8_i32 = arith.constant 8 : i32
    %c0_i32 = arith.constant 0 : i32
    %16 = arith.cmpi eq, %c8_i32, %c0_i32 : i32
    %c1_i32 = arith.constant 1 : i32
    %17 = arith.select %16, %c1_i32, %c8_i32 : i32
    %18 = vector.broadcast %17 : i32 to vector<64x1xi32>
    %19 = arith.remsi %15, %18 : vector<64x1xi32>
    %c0_i32_13 = arith.constant 0 : i32
    %20 = vector.broadcast %c0_i32_13 : i32 to vector<64x1xi32>
    %21 = arith.cmpi ne, %19, %20 : vector<64x1xi32>
    %c0_i32_14 = arith.constant 0 : i32
    %22 = vector.broadcast %c0_i32_14 : i32 to vector<64x1xi32>
    %23 = arith.cmpi slt, %19, %22 : vector<64x1xi32>
    %c0_i32_15 = arith.constant 0 : i32
    %24 = arith.cmpi slt, %17, %c0_i32_15 : i32
    %25 = vector.broadcast %24 : i1 to vector<64x1xi1>
    %26 = vector.broadcast %25 : vector<64x1xi1> to vector<64x1xi1>
    %27 = arith.xori %23, %26 : vector<64x1xi1>
    %28 = arith.andi %27, %21 : vector<64x1xi1>
    %29 = vector.broadcast %17 : i32 to vector<64x1xi32>
    %30 = arith.addi %19, %29 : vector<64x1xi32>
    %31 = arith.select %28, %30, %19 : vector<64x1xi1>, vector<64x1xi32>
    %c1_i32_16 = arith.constant 1 : i32
    %32 = vector.broadcast %c1_i32_16 : i32 to vector<64x1xi32>
    %33 = arith.cmpi sge, %31, %32 : vector<64x1xi32>
    %c6_i32 = arith.constant 6 : i32
    %34 = vector.broadcast %c6_i32 : i32 to vector<64x1xi32>
    %35 = arith.cmpi sle, %31, %34 : vector<64x1xi32>
    %cst_17 = arith.constant 0.000000e+00 : bf16
    %36 = vector.broadcast %cst_17 : bf16 to vector<16x384xbf16>
    %c0_18 = arith.constant 0 : index
    %c0_19 = arith.constant 0 : index
    %37 = vector.load %arg10[%c0_18, %c0_19] : memref<96x384xbf16, #tpu.memory_space<vmem>>, vector<16x384xbf16>
    tpu.vector_store %arg10[%c0_18, %c0_19], %36 {strides = array<i32>} : memref<96x384xbf16, #tpu.memory_space<vmem>>, vector<16x384xbf16>,
    %c80 = arith.constant 80 : index
    %c0_20 = arith.constant 0 : index
    %38 = vector.load %arg10[%c80, %c0_20] : memref<96x384xbf16, #tpu.memory_space<vmem>>, vector<16x384xbf16>
    tpu.vector_store %arg10[%c80, %c0_20], %36 {strides = array<i32>} : memref<96x384xbf16, #tpu.memory_space<vmem>>, vector<16x384xbf16>,
    %c7 = arith.constant 7 : index
    %c0_21 = arith.constant 0 : index
    %39 = vector.load %arg9[%c7, %c0_21] : memref<80x128xf32, #tpu.memory_space<vmem>>, vector<64x128xf32>
    %cst_22 = arith.constant 0.000000e+00 : f32
    %40 = vector.shape_cast %33 : vector<64x1xi1> to vector<64x1xi1>
    %41 = vector.broadcast %40 : vector<64x1xi1> to vector<64x128xi1>
    %42 = vector.broadcast %cst_22 : f32 to vector<64x128xf32>
    %43 = arith.select %41, %39, %42 : vector<64x128xi1>, vector<64x128xf32>
    %c9 = arith.constant 9 : index
    %c0_23 = arith.constant 0 : index
    %44 = vector.load %arg9[%c9, %c0_23] : memref<80x128xf32, #tpu.memory_space<vmem>>, vector<64x128xf32>
    %cst_24 = arith.constant 0.000000e+00 : f32
    %45 = vector.shape_cast %35 : vector<64x1xi1> to vector<64x1xi1>
    %46 = vector.broadcast %45 : vector<64x1xi1> to vector<64x128xi1>
    %47 = vector.broadcast %cst_24 : f32 to vector<64x128xf32>
    %48 = arith.select %46, %44, %47 : vector<64x128xi1>, vector<64x128xf32>
    %49 = arith.truncf %43 : vector<64x128xf32> to vector<64x128xbf16>
    %c16 = arith.constant 16 : index
    %c0_25 = arith.constant 0 : index
    %50 = vector.load %arg10[%c16, %c0_25] : memref<96x384xbf16, #tpu.memory_space<vmem>>, vector<64x128xbf16>
    tpu.vector_store %arg10[%c16, %c0_25], %49 {strides = array<i32>} : memref<96x384xbf16, #tpu.memory_space<vmem>>, vector<64x128xbf16>,
    %51 = arith.truncf %9 : vector<64x128xf32> to vector<64x128xbf16>
    %c16_26 = arith.constant 16 : index
    %c128 = arith.constant 128 : index
    %52 = vector.load %arg10[%c16_26, %c128] : memref<96x384xbf16, #tpu.memory_space<vmem>>, vector<64x128xbf16>
    tpu.vector_store %arg10[%c16_26, %c128], %51 {strides = array<i32>} : memref<96x384xbf16, #tpu.memory_space<vmem>>, vector<64x128xbf16>,
    %53 = arith.truncf %48 : vector<64x128xf32> to vector<64x128xbf16>
    %c16_27 = arith.constant 16 : index
    %c256 = arith.constant 256 : index
    %54 = vector.load %arg10[%c16_27, %c256] : memref<96x384xbf16, #tpu.memory_space<vmem>>, vector<64x128xbf16>
    tpu.vector_store %arg10[%c16_27, %c256], %53 {strides = array<i32>} : memref<96x384xbf16, #tpu.memory_space<vmem>>, vector<64x128xbf16>,
    %c0_28 = arith.constant 0 : index
    %c0_29 = arith.constant 0 : index
    %55 = vector.load %arg10[%c0_28, %c0_29] : memref<96x384xbf16, #tpu.memory_space<vmem>>, vector<96x384xbf16>
    %c0_30 = arith.constant 0 : index
    %c0_31 = arith.constant 0 : index
    %c0_32 = arith.constant 0 : index
    %56 = vector.load %arg3[%c0_30, %c0_31, %c0_32] : memref<3x384x128xbf16, #tpu.memory_space<vmem>>, vector<1x384x128xbf16>
    %57 = vector.shape_cast %56 : vector<1x384x128xbf16> to vector<384x128xbf16>
    %cst_33 = arith.constant dense<0.000000e+00> : vector<96x128xf32>
    %58 = tpu.matmul %55, %57, %cst_33 {dimension_numbers = #tpu.dot_dimension_numbers<[1], [0], [0], [1], [0, 0, 1, 1], [], []>} : vector<96x384xbf16>, vector<384x128xbf16>, vector<96x128xf32> -> vector<96x128xf32>
    %c0_34 = arith.constant 0 : index
    %c0_35 = arith.constant 0 : index
    %59 = vector.load %arg10[%c0_34, %c0_35] : memref<96x384xbf16, #tpu.memory_space<vmem>>, vector<96x384xbf16>
    %c1 = arith.constant 1 : index
    %c0_36 = arith.constant 0 : index
    %c0_37 = arith.constant 0 : index
    %60 = vector.load %arg3[%c1, %c0_36, %c0_37] : memref<3x384x128xbf16, #tpu.memory_space<vmem>>, vector<1x384x128xbf16>
    %61 = vector.shape_cast %60 : vector<1x384x128xbf16> to vector<384x128xbf16>
    %cst_38 = arith.constant dense<0.000000e+00> : vector<96x128xf32>
    %62 = tpu.matmul %59, %61, %cst_38 {dimension_numbers = #tpu.dot_dimension_numbers<[1], [0], [0], [1], [0, 0, 1, 1], [], []>} : vector<96x384xbf16>, vector<384x128xbf16>, vector<96x128xf32> -> vector<96x128xf32>
    %c0_39 = arith.constant 0 : index
    %c0_40 = arith.constant 0 : index
    %63 = vector.load %arg10[%c0_39, %c0_40] : memref<96x384xbf16, #tpu.memory_space<vmem>>, vector<96x384xbf16>
    %c2 = arith.constant 2 : index
    %c0_41 = arith.constant 0 : index
    %c0_42 = arith.constant 0 : index
    %64 = vector.load %arg3[%c2, %c0_41, %c0_42] : memref<3x384x128xbf16, #tpu.memory_space<vmem>>, vector<1x384x128xbf16>
    %65 = vector.shape_cast %64 : vector<1x384x128xbf16> to vector<384x128xbf16>
    %cst_43 = arith.constant dense<0.000000e+00> : vector<96x128xf32>
    %66 = tpu.matmul %63, %65, %cst_43 {dimension_numbers = #tpu.dot_dimension_numbers<[1], [0], [0], [1], [0, 0, 1, 1], [], []>} : vector<96x384xbf16>, vector<384x128xbf16>, vector<96x128xf32> -> vector<96x128xf32>
    %67 = vector.extract_strided_slice %58 {offsets = [8, 0], sizes = [64, 128], strides = [1, 1]} : vector<96x128xf32> to vector<64x128xf32>
    %68 = vector.extract_strided_slice %62 {offsets = [16, 0], sizes = [64, 128], strides = [1, 1]} : vector<96x128xf32> to vector<64x128xf32>
    %69 = arith.addf %67, %68 : vector<64x128xf32>
    %70 = vector.extract_strided_slice %66 {offsets = [24, 0], sizes = [64, 128], strides = [1, 1]} : vector<96x128xf32> to vector<64x128xf32>
    %71 = arith.addf %69, %70 : vector<64x128xf32>
    %c1_44 = arith.constant 1 : index
    %c0_45 = arith.constant 0 : index
    %72 = vector.load %arg7[%c1_44, %c0_45] : memref<8x128xf32, #tpu.memory_space<vmem>>, vector<1x128xf32>
    %73 = vector.broadcast %72 : vector<1x128xf32> to vector<64x128xf32>
    %74 = arith.addf %71, %73 : vector<64x128xf32>
    %cst_46 = arith.constant 0.000000e+00 : f32
    %75 = vector.broadcast %cst_46 : f32 to vector<64x128xf32>
    %76 = arith.maximumf %74, %75 : vector<64x128xf32>
    %cst_47 = arith.constant dense<0.000000e+00> : vector<128xf32>
    %77 = vector.multi_reduction <add>, %76, %cst_47 [0] : vector<64x128xf32> to vector<128xf32>
    %78 = vector.shape_cast %77 : vector<128xf32> to vector<1x128xf32>
    %cst_48 = arith.constant 6.400000e+01 : f32
    %79 = vector.broadcast %cst_48 : f32 to vector<1x128xf32>
    %80 = arith.divf %78, %79 : vector<1x128xf32>
    %81 = arith.truncf %80 : vector<1x128xf32> to vector<1x128xbf16>
    %c0_49 = arith.constant 0 : index
    %c0_50 = arith.constant 0 : index
    %82 = vector.load %arg4[%c0_49, %c0_50] : memref<128x128xbf16, #tpu.memory_space<vmem>>, vector<128x128xbf16>
    %cst_51 = arith.constant dense<0.000000e+00> : vector<1x128xf32>
    %83 = tpu.matmul %81, %82, %cst_51 {dimension_numbers = #tpu.dot_dimension_numbers<[1], [0], [0], [1], [0, 0, 1, 1], [], []>} : vector<1x128xbf16>, vector<128x128xbf16>, vector<1x128xf32> -> vector<1x128xf32>
    %c2_52 = arith.constant 2 : index
    %c0_53 = arith.constant 0 : index
    %84 = vector.load %arg7[%c2_52, %c0_53] : memref<8x128xf32, #tpu.memory_space<vmem>>, vector<1x128xf32>
    %85 = arith.addf %83, %84 : vector<1x128xf32>
    %cst_54 = arith.constant 0.000000e+00 : f32
    %86 = vector.broadcast %cst_54 : f32 to vector<1x128xf32>
    %87 = arith.maximumf %85, %86 : vector<1x128xf32>
    %88 = arith.truncf %87 : vector<1x128xf32> to vector<1x128xbf16>
    %c0_55 = arith.constant 0 : index
    %c0_56 = arith.constant 0 : index
    %89 = vector.load %arg5[%c0_55, %c0_56] : memref<128x128xbf16, #tpu.memory_space<vmem>>, vector<128x128xbf16>
    %cst_57 = arith.constant dense<0.000000e+00> : vector<1x128xf32>
    %90 = tpu.matmul %88, %89, %cst_57 {dimension_numbers = #tpu.dot_dimension_numbers<[1], [0], [0], [1], [0, 0, 1, 1], [], []>} : vector<1x128xbf16>, vector<128x128xbf16>, vector<1x128xf32> -> vector<1x128xf32>
    %c3 = arith.constant 3 : index
    %c0_58 = arith.constant 0 : index
    %91 = vector.load %arg7[%c3, %c0_58] : memref<8x128xf32, #tpu.memory_space<vmem>>, vector<1x128xf32>
    %92 = arith.addf %90, %91 : vector<1x128xf32>
    %93 = arith.negf %92 : vector<1x128xf32>
    %94 = math.exp %93 : vector<1x128xf32>
    %cst_59 = arith.constant 1.000000e+00 : f32
    %95 = vector.broadcast %cst_59 : f32 to vector<1x128xf32>
    %96 = arith.addf %95, %94 : vector<1x128xf32>
    %97 = arith.divf %95, %96 : vector<1x128xf32>
    %98 = vector.broadcast %97 : vector<1x128xf32> to vector<64x128xf32>
    %99 = arith.mulf %76, %98 : vector<64x128xf32>
    %100 = arith.truncf %99 : vector<64x128xf32> to vector<64x128xbf16>
    %c0_60 = arith.constant 0 : index
    %c0_61 = arith.constant 0 : index
    %101 = vector.load %arg6[%c0_60, %c0_61] : memref<128x128xbf16, #tpu.memory_space<vmem>>, vector<128x128xbf16>
    %cst_62 = arith.constant dense<0.000000e+00> : vector<64x128xf32>
    %102 = tpu.matmul %100, %101, %cst_62 {dimension_numbers = #tpu.dot_dimension_numbers<[1], [0], [0], [1], [0, 0, 1, 1], [], []>} : vector<64x128xbf16>, vector<128x128xbf16>, vector<64x128xf32> -> vector<64x128xf32>
    %c4 = arith.constant 4 : index
    %c0_63 = arith.constant 0 : index
    %103 = vector.load %arg7[%c4, %c0_63] : memref<8x128xf32, #tpu.memory_space<vmem>>, vector<1x128xf32>
    %104 = vector.broadcast %103 : vector<1x128xf32> to vector<64x128xf32>
    %105 = arith.addf %102, %104 : vector<64x128xf32>
    %c0_64 = arith.constant 0 : index
    %c0_65 = arith.constant 0 : index
    %c0_66 = arith.constant 0 : index
    %106 = vector.load %arg1[%c0_64, %c0_65, %c0_66] : memref<1x64x128xf32, #tpu.memory_space<vmem>>, vector<1x64x128xf32>
    %107 = vector.shape_cast %106 : vector<1x64x128xf32> to vector<64x128xf32>
    %108 = arith.addf %105, %107 : vector<64x128xf32>
    %cst_67 = arith.constant 0.000000e+00 : f32
    %109 = vector.broadcast %cst_67 : f32 to vector<64x128xf32>
    %110 = arith.maximumf %108, %109 : vector<64x128xf32>
    %c0_68 = arith.constant 0 : index
    %c0_69 = arith.constant 0 : index
    %c0_70 = arith.constant 0 : index
    %111 = vector.load %arg8[%c0_68, %c0_69, %c0_70] : memref<1x64x128xf32, #tpu.memory_space<vmem>>, vector<1x64x128xf32>
    %112 = vector.shape_cast %111 : vector<1x64x128xf32> to vector<64x128xf32>
    %113 = vector.shape_cast %110 : vector<64x128xf32> to vector<1x64x128xf32>
    tpu.vector_store %arg8[%c0_68, %c0_69, %c0_70], %113 {strides = array<i32>} : memref<1x64x128xf32, #tpu.memory_space<vmem>>, vector<1x64x128xf32>,
    return
  }
  func.func @transform_0(%arg0: i32) -> (i32, i32, i32) {
    %c0_i32 = arith.constant 0 : i32
    %c0_i32_0 = arith.constant 0 : i32
    %c0_i32_1 = arith.constant 0 : i32
    return %arg0, %c0_i32, %c0_i32_0 : i32, i32, i32
  }
  func.func @transform_1(%arg0: i32) -> (i32, i32) {
    %c0_i32 = arith.constant 0 : i32
    %c0_i32_0 = arith.constant 0 : i32
    %c0_i32_1 = arith.constant 0 : i32
    return %c0_i32, %c0_i32_0 : i32, i32
  }
  func.func @transform_2(%arg0: i32) -> (i32, i32, i32) {
    %c0_i32 = arith.constant 0 : i32
    %c0_i32_0 = arith.constant 0 : i32
    %c0_i32_1 = arith.constant 0 : i32
    %c0_i32_2 = arith.constant 0 : i32
    return %c0_i32, %c0_i32_0, %c0_i32_1 : i32, i32, i32
  }
  func.func @transform_3(%arg0: i32) -> (i32, i32) {
    %c0_i32 = arith.constant 0 : i32
    %c0_i32_0 = arith.constant 0 : i32
    %c0_i32_1 = arith.constant 0 : i32
    return %c0_i32, %c0_i32_0 : i32, i32
  }
  func.func @transform_4(%arg0: i32) -> (i32, i32) {
    %c0_i32 = arith.constant 0 : i32
    %c0_i32_0 = arith.constant 0 : i32
    %c0_i32_1 = arith.constant 0 : i32
    return %c0_i32, %c0_i32_0 : i32, i32
  }
  func.func @transform_5(%arg0: i32) -> (i32, i32) {
    %c0_i32 = arith.constant 0 : i32
    %c0_i32_0 = arith.constant 0 : i32
    %c0_i32_1 = arith.constant 0 : i32
    return %c0_i32, %c0_i32_0 : i32, i32
  }
  func.func @transform_6(%arg0: i32) -> (i32, i32) {
    %c0_i32 = arith.constant 0 : i32
    %c0_i32_0 = arith.constant 0 : i32
    %c0_i32_1 = arith.constant 0 : i32
    return %c0_i32, %c0_i32_0 : i32, i32
  }
  func.func @transform_7(%arg0: i32) -> (i32, i32, i32) {
    %c0_i32 = arith.constant 0 : i32
    %c0_i32_0 = arith.constant 0 : i32
    %c0_i32_1 = arith.constant 0 : i32
    return %arg0, %c0_i32, %c0_i32_0 : i32, i32, i32
  }
}

</mosaic_0001>

<bundles_post_ra>
// kernel: tpu_custom_call.1
= control target key start
LH: loop header
LB: loop body
LE: loop exit
PB: predicated region body
PF: predicated region fallthrough
CT: control target
= control target key end

     0   :  { %s4331_s0 = inlined_call_operand.hbm [shape: f32[2,64,128], index: 0, kind: input, shape index: {}]   ;;  %s4332_s1 = inlined_call_operand.hbm [shape: bf16[128,128], index: 1, kind: input, shape index: {}]   ;;  %s4333_s2 = inlined_call_operand.hbm [shape: bf16[3,384,128], index: 2, kind: input, shape index: {}]   ;;  %s4334_s3 = inlined_call_operand.hbm [shape: bf16[128,128], index: 3, kind: input, shape index: {}]   ;;  %s4335_s4 = inlined_call_operand.hbm [shape: bf16[128,128], index: 4, kind: input, shape index: {}]   ;;  %s4336_s5 = inlined_call_operand.hbm [shape: bf16[128,128], index: 5, kind: input, shape index: {}]   ;;  %s4337_s6 = inlined_call_operand.vmem [shape: f32[8,128], index: 6, kind: input, shape index: {}]   ;;  %s4338_s7 = inlined_call_operand.hbm [shape: f32[2,64,128], index: 7, kind: output, shape index: {}]  }
   0x1   :  { %4343 = sst [smem:[#allocation21_spill]] %s4332_s1 }
   0x2   :  { %12 = vsyncpa [#allocation5], 0 }
   0x3   :  { %14 = vsyncpa [#allocation5 + $0x1], 0 }
   0x4   :  { %15 = vsyncpa [#allocation8], 0 }
   0x5   :  { %16 = vsyncpa [#allocation11], 0 }
   0x6   :  { %17 = vsyncpa [#allocation14], 0 }
   0x7   :  { %18 = vsyncpa [#allocation6], 0 }
   0x8   :  { %20 = vsyncpa [#allocation6 + $0x1], 0  ;;  %s3732_s24 = smov 0   ;;  %s3734_s25 = smov 0  }
   0x9   :  { %s3736_s26 = smov 0   ;;  %s3738_s27 = smov 0  }
   0xa LB: > { %s3676_s28 = smov [#allocation7]   ;;  %s3753_s30 = sadd.s32 4294967295, %s3674_s27   ;;  %s3674_s27 = sphi %s3738_s27, %s4390_s27   ;;  %s3670_s26 = sphi %s3736_s26, %s4389_s26   ;;  %s3666_s25 = sphi %s3734_s25, %s4388_s25   ;;  %s3662_s24 = sphi %s3732_s24, %s4387_s24  }
   0xb   : > { %s221_s29 = sshll.u32 %s3676_s28, 4  ;;  %p2597_p0 = scmp.ge.s32.totalorder %s3674_s27, 1  ;;  %s222_s29 = int_to_ptr.vmem [resolvable:$true] %s221_s29 }
   0xc   : > { %p4339_p1 = scmp.eq.s32.totalorder %s3753_s30, 0  ;;  %p209_p2 = scmp.lt.s32.totalorder %s3674_s27, 3 }
   0xd   : > { %s3677_s9 = smov [#allocation10]   ;;  %s3678_s12 = smov [#allocation9]  }
   0xe   : > { %p3758_p3 = pnand %p2597_p0, %p209_p2  ;;  %s247_s10 = sshll.u32 %s3677_s9, 4  ;;  %s3771_s10 = int_to_ptr.vmem [resolvable:$true] %s247_s10 }
   0xf   : > { %s234_s13 = sshll.u32 %s3678_s12, 4  ;;  %s3451_s15 = scalar_lea.vmem %s222_s29, 1024  ;;  %s3773_s13 = int_to_ptr.vmem [resolvable:$true] %s234_s13 }
  0x10   : > { %s4344_s8 = scalar_select %p3758_p3, 1, 0 }
  0x11   : > { %p3232_p5 = pneg %p3758_p3  ;;  %p3452_p8 = scmp.ne.s32.totalorder %s222_s29, %s3451_s15 }
  0x12   : > { %p3459_p11 = scmp.lt.s32.totalorder %s222_s29, %s222_s29  ;;  %p3460_p12 = scmp.lt.s32.totalorder %s3451_s15, %s3451_s15 }
  0x13   : > { %p3767_p6 = pnand %p3232_p5, %p4339_p1 }
  0x14   : > { %p3461_p13 = por %p3460_p12, %p3459_p11 }
  0x15   : > { %p3777_p7 = pneg %p3767_p6 }
  0x17   : > { %p3454_p9 = pnand %p3452_p8, %p3777_p7 }
  0x19   : > { %p3455_p10 = pneg %p3454_p9 }
  0x1b   : > { %p3462_p0 = pnand %p3461_p13, %p3455_p10 }
  0x1d   : > { %3465 = shalt.err (!%p3462_p0)
}
  0x1e   : > { %s3679_s16 = smov 64   ;;  %s3680_s17 = smov 4  }
  0x1f   : > { %s4347_s1 = sld [smem:[#allocation21_spill]]  ;;  %s3477_s20 = scalar_lea.vmem %s3771_s10, 1024 }
  0x20   : > { %p3478_p2 = scmp.ne.s32.totalorder %s3771_s10, %s3477_s20  ;;  %p3485_p9 = scmp.lt.s32.totalorder %s3771_s10, %s3771_s10 }
  0x21   : > { %p3486_p10 = scmp.lt.s32.totalorder %s3477_s20, %s3477_s20 }
  0x22   : > { %p3480_p5 = pnand %p3478_p2, %p3777_p7 }
  0x23   : > { %p3487_p11 = por %p3486_p10, %p3485_p9 }
  0x24   : > { %p3481_p8 = pneg %p3480_p5 }
  0x25   : > { %3235 = dma.hbm_to_vmem [thread:$0]  (!%p3767_p6), %s4347_s1, 1024, %s222_s29, [#allocation8], %s3679_s16, %s3679_s16, %s3680_s17  }
  0x26   : > { %p3488_p12 = pnand %p3487_p11, %p3481_p8 }
  0x28   : > { %3491 = shalt.err (!%p3488_p12)
}
  0x29   : > { %3241 = dma.hbm_to_vmem [thread:$0]  (!%p3767_p6), %s4334_s3, 1024, %s3771_s10, [#allocation11], %s3679_s16, %s3679_s16, %s3680_s17  }
  0x2a   : > { %s3503_s23 = scalar_lea.vmem %s3773_s13, 9216  ;;  %p3511_p5 = scmp.lt.s32.totalorder %s3773_s13, %s3773_s13 }
  0x2b   : > { %p3504_p13 = scmp.ne.s32.totalorder %s3773_s13, %s3503_s23  ;;  %p3512_p8 = scmp.lt.s32.totalorder %s3503_s23, %s3503_s23 }
  0x2d   : > { %p3506_p0 = pnand %p3504_p13, %p3777_p7  ;;  %p3513_p9 = por %p3512_p8, %p3511_p5 }
  0x2f   : > { %p3507_p2 = pneg %p3506_p0 }
  0x31   : > { %p3514_p10 = pnand %p3513_p9, %p3507_p2 }
  0x33   : > { %3517 = shalt.err (!%p3514_p10)
}
  0x34   : > { %3238 = dma.hbm_to_vmem [thread:$0]  (!%p3767_p6), %s4333_s2, 9216, %s3773_s13, [#allocation8], %s3679_s16, %s3679_s16, %s3680_s17  }
  0x35   : > { %s3681_s9 = smov [#allocation12]   ;;  %s3682_s12 = smov [#allocation13]  }
  0x36   : > { %s260_s10 = sshll.u32 %s3681_s9, 4  ;;  %s273_s15 = sshll.u32 %s3682_s12, 4  ;;  %s261_s10 = int_to_ptr.vmem [resolvable:$true] %s260_s10  ;;  %s274_s15 = int_to_ptr.vmem [resolvable:$true] %s273_s15 }
  0x37   : > { %s3529_s18 = scalar_lea.vmem %s261_s10, 1024  ;;  %p3537_p0 = scmp.lt.s32.totalorder %s261_s10, %s261_s10 }
  0x38   : > { %p3530_p11 = scmp.ne.s32.totalorder %s261_s10, %s3529_s18  ;;  %p3538_p2 = scmp.lt.s32.totalorder %s3529_s18, %s3529_s18 }
  0x3a   : > { %p3532_p12 = pnand %p3530_p11, %p3777_p7  ;;  %p3539_p5 = por %p3538_p2, %p3537_p0 }
  0x3c   : > { %p3533_p13 = pneg %p3532_p12 }
  0x3e   : > { %p3540_p8 = pnand %p3539_p5, %p3533_p13 }
  0x40   : > { %3543 = shalt.err (!%p3540_p8)
}
  0x41   : > { %3244 = dma.hbm_to_vmem [thread:$0]  (!%p3767_p6), %s4335_s4, 1024, %s261_s10, [#allocation11], %s3679_s16, %s3679_s16, %s3680_s17  }
  0x42   : > { %s3555_s20 = scalar_lea.vmem %s274_s15, 1024  ;;  %p3563_p12 = scmp.lt.s32.totalorder %s274_s15, %s274_s15 }
  0x43   : > { %p3556_p9 = scmp.ne.s32.totalorder %s274_s15, %s3555_s20  ;;  %p3564_p0 = scmp.lt.s32.totalorder %s3555_s20, %s3555_s20 }
  0x45   : > { %p3558_p10 = pnand %p3556_p9, %p3777_p7  ;;  %p3565_p13 = por %p3564_p0, %p3563_p12 }
  0x47   : > { %p3559_p11 = pneg %p3558_p10 }
  0x49   : > { %p3566_p2 = pnand %p3565_p13, %p3559_p11 }
  0x4b   : > { %3569 = shalt.err (!%p3566_p2)
}
  0x4c   : > { %3247 = dma.hbm_to_vmem [thread:$0]  (!%p3767_p6), %s4336_s5, 1024, %s274_s15, [#allocation14], %s3679_s16, %s3679_s16, %s3680_s17  }
  0x4d   : > { %s2596_s11 = sadd.s32 4294967294, %s3674_s27   ;;  %s3843_s14 = sadd.s32 1, %s3674_s27  }
  0x4e   : > { %s33_s23 = sadd.s32 1, %s3670_s26  ;;  %s30_s28 = ssub.s32 %s3674_s27, %s3843_s14 }
  0x4f   : > { %p40_p7 = scmp.ne.s32.totalorder %s3670_s26, %s3666_s25  ;;  %p31_p5 = scmp.eq.s32.totalorder %s30_s28, 0 }
  0x50   : > { %p41_p8 = scmp.eq.s32.totalorder %s3674_s27, 0  ;;  %p46_p9 = scmp.ne.s32.totalorder %s3666_s25, %s3662_s24 }
  0x51   : > { %p196_p10 = scmp.eq.s32.totalorder %s3753_s30, 1  ;;  %p202_p0 = scmp.eq.s32.totalorder %s2596_s11, 1 }
  0x52   : > { %s3855_s29 = scalar_select %p31_p5, %s3670_s26, %s33_s23  }
  0x53   : > { %p42_p11 = por %p41_p8, %p40_p7  ;;  %p3859_p12 = por %p4339_p1, %p46_p9 }
  0x54   : > { %p3863_p6 = por %p196_p10, %p40_p7  ;;  %p3261_p13 = scmp.lt.s32.totalorder %s3674_s27, 2 }
  0x55   : > { %s4348_s9 = scalar_select %p3859_p12, 1, 0 }
  0x56   : > { %s4349_s16 = scalar_select %p3863_p6, 1, 0 }
  0x57   : > { %s290_s17 = sand.u32 1, %s3670_s26   ;;  %p3869_p2 = por %p202_p0, %p46_p9 }
  0x58   : > { %s2604_s12 = sshll.u32 %s290_s17, 6  ;;  %s2770_s15 = sshll.u32 %s3674_s27, 10 }
  0x59   : > { %s4350_s10 = scalar_select %p3869_p2, 1, 0 }
  0x5a   : > { %s3877_s19 = scalar_lea.hbm %s4331_s0, %s2770_s15  ;;  %s294_s20 = scalar_lea.vmem [#allocation4], %s2604_s12 }
  0x5b   : > { %s301_s21 = sshll.u32 %s294_s20, 4  ;;  %p3879_p7 = pnand %p3261_p13, %p42_p11  ;;  %s3883_s21 = int_to_ptr.vmem [resolvable:$true] %s301_s21 }
  0x5c   : > { %s3885_s11 = scalar_lea.sflag [#allocation5], %s290_s17  ;;  %s3570_s23 = scalar_lea.hbm %s3877_s19, 1024 }
  0x5d   : > { %p3571_p5 = scmp.ne.s32.totalorder %s3877_s19, %s3570_s23  ;;  %p3572_p8 = pneg %p3879_p7 }
  0x5e   : > { %s3575_s12 = scalar_lea.hbm %s4331_s0, 2048  ;;  %p3576_p11 = scmp.lt.s32.totalorder %s3877_s19, %s4331_s0 }
  0x5f   : > { %p3573_p9 = pnand %p3572_p8, %p3571_p5  ;;  %p3577_p0 = scmp.lt.s32.totalorder %s3575_s12, %s3570_s23 }
  0x61   : > { %p3574_p10 = pneg %p3573_p9  ;;  %p3578_p13 = por %p3577_p0, %p3576_p11 }
  0x63   : > { %p3579_p4 = pnand %p3578_p13, %p3574_p10 }
  0x65   : > { %3582 = shalt.err (!%p3579_p4)
}
  0x66   : > { %s3583_s17 = scalar_lea.vmem %s3883_s21, 1024  ;;  %s3683_s20 = smov [#allocation4]  }
  0x67   : > { %p3584_p1 = scmp.ne.s32.totalorder %s3883_s21, %s3583_s17  ;;  %s3588_s1 = sshll.u32 %s3683_s20, 4  ;;  %s3589_s1 = int_to_ptr.vmem [resolvable:$false] %s3588_s1 }
  0x68   : > { %s3590_s28 = scalar_lea.vmem %s3589_s1, 2048  ;;  %p3591_p9 = scmp.lt.s32.totalorder %s3883_s21, %s3589_s1 }
  0x69   : > { %p3586_p2 = pnand %p3584_p1, %p3572_p8  ;;  %p3592_p6 = scmp.lt.s32.totalorder %s3590_s28, %s3583_s17 }
  0x6b   : > { %p3587_p5 = pneg %p3586_p2  ;;  %p3593_p12 = por %p3592_p6, %p3591_p9 }
  0x6d   : > { %p3594_p3 = pnand %p3593_p12, %p3587_p5 }
  0x6f   : > { %3597 = shalt.err (!%p3594_p3)
}
  0x70   : > { %s3684_s23 = smov 128   ;;  %s3685_s15 = smov 8  }
  0x71   : > { %3251 = dma.hbm_to_vmem [thread:$0]  (!%p3879_p7), %s3877_s19, 1024, %s3883_s21, %s3885_s11, %s3684_s23, %s3684_s23, %s3685_s15  }
  0x72   : > { %p4352_p1 = scmp.ne.s32.totalorder %s4344_s8, 0 }
  0x73   : > { %s3909_s12 = sand.u32 (!%p4352_p1), 1, %s3666_s25   ;;  %p4353_p3 = scmp.ne.s32.totalorder (!%p4352_p1), %s4348_s9, 0 }
  0x74   : > { %313 = sbr.rel (%p4352_p1) target bundleno = 1379 (0x563), region = 48  ;;  %s2608_s1 = sshll.u32 (!%p4352_p1), %s3909_s12, 6 }
  0x75   : > { %s316_s18 = scalar_lea.sflag (!%p4352_p1), [#allocation5], %s3909_s12  ;;  %s3915_s13 = scalar_lea.vmem (!%p4352_p1), [#allocation4], %s2608_s1 }
  0x79   : > { %3641 = dma.done.wait (%p4353_p3), %s316_s18, 1024  }
  0x7a   : > { %3643 = vsyncadd (%p4353_p3), %s316_s18, 4294966272  ;;  %p4354_p4 = scmp.eq.s32.totalorder %s3753_s30, 0 }
  0x7c   : > { %3645 = dma.done.wait (%p4354_p4), [#allocation8], 10240   ;;  %p4355_p12 = pmov %p4354_p4 }
  0x7d   : > { %p4356_p6 = pmov %p4354_p4 }
  0x7e   : > { %3647 = vsyncadd (%p4355_p12), [#allocation8], 4294957056 }
  0x7f   : > { %3649 = dma.done.wait (%p4356_p6), [#allocation11], 2048   ;;  %p4357_p2 = pmov %p4354_p4 }
  0x81   : > { %3651 = vsyncadd (%p4357_p2), [#allocation11], 4294965248  ;;  %p4358_p7 = pmov %p4357_p2 }
  0x82   : > { %p4359_p8 = pmov %p4357_p2 }
  0x83   : > { %3653 = dma.done.wait (%p4358_p7), [#allocation14], 1024  }
  0x84   : > { %3655 = vsyncadd (%p4359_p8), [#allocation14], 4294966272  ;;  %v3314_v0 = vld [vmem:[#allocation7 + $0x38] sm:$0xff]   ;;  %v3315_v1 = vld [vmem:[#allocation7 + $0x30] sm:$0xff]   ;;  %v3686_v35 = vmov 0.0   ;;  %v3687_v42 = vmov 0  }
  0x85   : > { %3036 = vmatprep.subr.bf16.mxu0 %v3314_v0  ;;  %v3316_v2 = vld [vmem:[#allocation7 + $0x28] sm:$0xff]   ;;  %v3317_v3 = vld [vmem:[#allocation7 + $0x20] sm:$0xff]   ;;  %v3318_v7 = vld [vmem:[#allocation7 + $0x18] sm:$0xff]   ;;  %525 = vst [vmem:[#allocation2] sm:$0xff] %v3686_v35  ;;  %v3943_v43 = vcombine.high %v3687_v42, %v3687_v42  ;;  %v3945_v44 = vcombine.low %v3687_v42, %v3687_v42  ;;  %s4267_s15 = scalar_lea.vmem [#allocation15], %s2608_s1  ;;  %s2795_s18 = sshll.u32 %s3753_s30, 10 }
  0x86   : > { %3037 = vmatpush3.bf16.msra.mxu0 %v3314_v0  ;;  %v371_v4 = vld [vmem:[%s3915_s13] sm:$0xff]  ;;  %v372_v5 = vld [vmem:[%s3915_s13 + $0x8] sm:$0xff]  ;;  %v3322_v8 = vld [vmem:[#allocation9 + $0x78] sm:$0xff]   ;;  %526 = vst [vmem:[#allocation2 + $0x48] sm:$0xff] %v3686_v35  ;;  %s2475_s1 = sshll.u32 %s4267_s15, 4  ;;  %s4286_s19 = scalar_lea.hbm %s4338_s7, %s2795_s18  ;;  %s4280_s1 = int_to_ptr.vmem [resolvable:$true] %s2475_s1 }
  0x87   : > { %3038 = vmatprep.subr.bf16.mxu0 %v3315_v1  ;;  %v379_v6 = vpack.c.bf16 %v372_v5, %v371_v4  ;;  %v3323_v9 = vld [vmem:[#allocation9 + $0x38] sm:$0xff]   ;;  %2808 = vmatprep.subr.bf16.mxu1 %v3322_v8  ;;  %v3324_v10 = vld [vmem:[#allocation9 + $0x70] sm:$0xff]   ;;  %v3326_v12 = vld [vmem:[#allocation9 + $0x68] sm:$0xff]   ;;  %657 = vst [vmem:[#allocation3 + $0x8] sm:$0xf] %v3687_v42  ;;  %s3598_s21 = scalar_lea.vmem %s4280_s1, 1024 }
  0x88   : > { %2809 = vmatpush3.bf16.msra.mxu1 %v3323_v9  ;;  %v3325_v11 = vld [vmem:[#allocation9 + $0x30] sm:$0xff]   ;;  %v3327_v14 = vld [vmem:[#allocation9 + $0x28] sm:$0xff]   ;;  %v3328_v16 = vld [vmem:[#allocation9 + $0x60] sm:$0xff]   ;;  %659 = vst [vmem:[#allocation3 + $0x14] sm:$0xf] %v3687_v42  ;;  %1192 = vmatprep.mubr.bf16.mxu1 %v3943_v43  ;;  %p3599_p10 = scmp.ne.s32.totalorder %s4280_s1, %s3598_s21  ;;  %p4384_p11 = scmp.ne.s32.totalorder %s4349_s16, 0 }
  0x89   : > { %3052 = vmatprep.mubr.bf16.mxu0 %v379_v6  ;;  %2810 = vmatprep.subr.bf16.mxu1 %v3324_v10  ;;  %v3319_v13 = vld [vmem:[#allocation7 + $0x10] sm:$0xff]   ;;  %v3320_v15 = vld [vmem:[#allocation7 + $0x8] sm:$0xff]   ;;  %v3321_v17 = vld [vmem:[#allocation7] sm:$0xff]   ;;  %661 = vst [vmem:[#allocation3 + $0x80] sm:$0xf] %v3687_v42  ;;  %s3689_s30 = smov [#allocation15]  }
  0x8a   : > { %3039 = vmatpush3.bf16.msra.mxu0 %v3315_v1  ;;  %v373_v18 = vld [vmem:[%s3915_s13 + $0x10] sm:$0xff]  ;;  %v374_v19 = vld [vmem:[%s3915_s13 + $0x18] sm:$0xff]  ;;  %v375_v20 = vld [vmem:[%s3915_s13 + $0x20] sm:$0xff]  ;;  %663 = vst [vmem:[#allocation3 + $0x8c] sm:$0xf] %v3687_v42  ;;  %p3600_p0 = pnand %p3599_p10, %p4384_p11  ;;  %s3602_s22 = sshll.u32 %s3689_s30, 4  ;;  %s3603_s22 = int_to_ptr.vmem [resolvable:$false] %s3602_s22 }
  0x8b   : > { %3040 = vmatprep.subr.bf16.mxu0 %v3316_v2  ;;  %v376_v21 = vld [vmem:[%s3915_s13 + $0x28] sm:$0xff]  ;;  %v3329_v22 = vld [vmem:[#allocation9 + $0xb8] sm:$0xff]   ;;  %v380_v23 = vpack.c.bf16 %v374_v19, %v373_v18  ;;  %v377_v25 = vld [vmem:[%s3915_s13 + $0x30] sm:$0xff]  ;;  %s3604_s11 = scalar_lea.vmem %s3603_s22, 2048  ;;  %p3605_p5 = scmp.lt.s32.totalorder %s4280_s1, %s3603_s22 }
  0x8c   : > { %2811 = vmatpush3.bf16.msra.mxu1 %v3325_v11  ;;  %v381_v24 = vpack.c.bf16 %v376_v21, %v375_v20  ;;  %v378_v26 = vld [vmem:[%s3915_s13 + $0x38] sm:$0xff]  ;;  %v3330_v28 = vld [vmem:[#allocation9 + $0x20] sm:$0xff]   ;;  %v3332_v30 = vld [vmem:[#allocation9 + $0xb0] sm:$0xff]   ;;  %p3601_p13 = pneg %p3600_p0  ;;  %p3606_p9 = scmp.lt.s32.totalorder %s3604_s11, %s3598_s21 }
  0x8d   : > { %2812 = vmatprep.subr.bf16.mxu1 %v3326_v12  ;;  %v382_v27 = vpack.c.bf16 %v378_v26, %v377_v25  ;;  %v3331_v29 = vld [vmem:[#allocation9 + $0x58] sm:$0xff]   ;;  %v3334_v32 = vld [vmem:[#allocation9 + $0x50] sm:$0xff]   ;;  %v3335_v33 = vld [vmem:[#allocation9 + $0xa8] sm:$0xff]  }
  0x8e   : > { %3041 = vmatpush3.bf16.msra.mxu0 %v3316_v2  ;;  %v3333_v31 = vld [vmem:[#allocation9 + $0x18] sm:$0xff]   ;;  %v3336_v34 = vld [vmem:[#allocation9 + $0x10] sm:$0xff]   ;;  %v3337_v36 = vld [vmem:[#allocation9 + $0x48] sm:$0xff]   ;;  %p3607_p1 = por %p3606_p9, %p3605_p5 }
  0x8f   : > { %3042 = vmatprep.subr.bf16.mxu0 %v3317_v3  ;;  %v3338_v37 = vld [vmem:[#allocation9 + $0xa0] sm:$0xff]   ;;  %v3339_v38 = vld [vmem:[#allocation9 + $0x8] sm:$0xff]   ;;  %v3341_v40 = vld [vmem:[#allocation9 + $0x98] sm:$0xff]  }
  0x90   : > { %2813 = vmatpush3.bf16.msra.mxu1 %v3327_v14  ;;  %v3340_v39 = vld [vmem:[#allocation9 + $0x40] sm:$0xff]   ;;  %v3343_v45 = vld [vmem:[#allocation9 + $0x90] sm:$0xff]   ;;  %v3344_v46 = vld [vmem:[#allocation9 + $0x88] sm:$0xff]   ;;  %p3608_p3 = pnand %p3607_p1, %p3601_p13 }
  0x91   : > { %2814 = vmatprep.subr.bf16.mxu1 %v3328_v16  ;;  %v3342_v41 = vld [vmem:[#allocation9] sm:$0xff]   ;;  %v3951_v49 = vld [vmem:[#allocation9 + $0x178] sm:$0xff]   ;;  %v3348_v52 = vld [vmem:[#allocation9 + $0x130] sm:$0xff]  }
  0x92   : > { %3043 = vmatpush3.bf16.msra.mxu0 %v3317_v3  ;;  %v3347_v47 = vld [vmem:[#allocation9 + $0x80] sm:$0xff]   ;;  %v3345_v50 = vld [vmem:[#allocation9 + $0x138] sm:$0xff]   ;;  %v3350_v53 = vld [vmem:[#allocation9 + $0xf0] sm:$0xff]   ;;  %v535_v3 = vlaneseq }
  0x93   : > { %3044 = vmatprep.subr.bf16.mxu0 %v3318_v7  ;;  %v3949_v48 = vld [vmem:[#allocation3 + $0x8] ss:$12 sps:$4 sm:$0xff]   ;;  %v3360_v54 = vld [vmem:[#allocation9 + $0x128] sm:$0xff]   ;;  %v3378_v60 = vld [vmem:[#allocation9 + $0x110] sm:$0xff]  }
  0x94   : > { %2815 = vmatpush3.bf16.msra.mxu1 %v3330_v28  ;;  %v3346_v51 = vld [vmem:[#allocation9 + $0xf8] sm:$0xff]   ;;  %v3361_v55 = vld [vmem:[#allocation9 + $0xe8] sm:$0xff]   ;;  %v3368_v56 = vld [vmem:[#allocation9 + $0x120] sm:$0xff]   ;;  %v3961_v5 = vshrl.u32 %v535_v3, 7 }
  0x95   : > { %2816 = vmatprep.subr.bf16.mxu1 %v3331_v29  ;;  %v3369_v57 = vld [vmem:[#allocation9 + $0xe0] sm:$0xff]   ;;  %v3372_v58 = vld [vmem:[#allocation9 + $0x118] sm:$0xff]   ;;  %v3380_v61 = vld [vmem:[#allocation9 + $0xd0] sm:$0xff]  }
  0x96   : > { %3045 = vmatpush3.bf16.msra.mxu0 %v3318_v7  ;;  %v3374_v59 = vld [vmem:[#allocation9 + $0xd8] sm:$0xff]   ;;  %v3384_v62 = vld [vmem:[#allocation9 + $0x108] sm:$0xff]   ;;  %v3388_v0 = vld [vmem:[#allocation9 + $0x100] sm:$0xff]   ;;  %v539_v11 = vadd.s32 24, %v3961_v5  ;;  %v537_v14 = vadd.s32 8, %v3961_v5  ;;  %v548_v18 = vand.u32 7, %v3961_v5 }
  0x97   : > { %3046 = vmatprep.subr.bf16.mxu0 %v3319_v13  ;;  %v3385_v63 = vld [vmem:[#allocation9 + $0xc8] sm:$0xff]   ;;  %v3389_v1 = vld [vmem:[#allocation9 + $0xc0] sm:$0xff]   ;;  %v3955_v2 = vld [vmem:[#allocation9 + $0x238] sm:$0xff]   ;;  %v543_v42 = vadd.s32 56, %v3961_v5 }
  0x98   : > { %2817 = vmatpush3.bf16.msra.mxu1 %v3333_v31  ;;  %v2615_v4 = vld [vmem:[%s4337_s6] ss:$0 sm:$0xff]  ;;  %v555_v25 = vand.u32 7, %v537_v14  ;;  %vm3970_vm0 = vcmp.ge.s32.totalorder %v548_v18, 1  ;;  %vm3992_vm5 = vcmp.le.s32.totalorder %v548_v18, 6  ;;  %v3400_v31 = vld [vmem:[#allocation9 + $0x1d0] sm:$0xff]  }
  0x99   : > { %2818 = vmatprep.subr.bf16.mxu1 %v3334_v32  ;;  %v597_v3 = vand.u32 7, %v543_v42 }
  0x9a   : > { %3047 = vmatpush3.bf16.msra.mxu0 %v3319_v13  ;;  %v538_v13 = vadd.s32 16, %v3961_v5  ;;  %vm3982_vm3 = vcmp.ge.s32.totalorder %v555_v25, 1  ;;  %vm3996_vm6 = vcmp.le.s32.totalorder %v555_v25, 6 }
  0x9b   : > { %3048 = vmatprep.subr.bf16.mxu0 %v3320_v15  ;;  %vm647_vm9 = vcmp.ge.s32.totalorder %v597_v3, 1  ;;  %vm655_vm11 = vcmp.le.s32.totalorder %v597_v3, 6 }
  0x9c   : > { %2819 = vmatpush3.bf16.msra.mxu1 %v3336_v34 }
  0x9d   : > { %2820 = vmatprep.subr.bf16.mxu1 %v3337_v36 }
  0x9e   : > { %3049 = vmatpush3.bf16.msra.mxu0 %v3320_v15 }
  0x9f   : > { %3050 = vmatprep.subr.bf16.mxu0 %v3321_v17 }
  0xa0   : > { %2821 = vmatpush3.bf16.msra.mxu1 %v3339_v38 }
  0xa1   : > { %2822 = vmatprep.subr.bf16.mxu1 %v3340_v39 }
  0xa2   : > { %3051 = vmatpush3.bf16.msra.mxu0 %v3321_v17 }
  0xa3   : > { %3060 = vmatprep.subr.bf16.mxu0 %v3329_v22 }
  0xa4   : > { %2823 = vmatpush3.bf16.msra.mxu1 %v3342_v41 }
  0xa5   : > { %3053 = vmatmul.mubr.bf16.vlgmr.msra.gmra.mxu0 %v380_v23  ;;  %2874 = vmatprep.subr.bf16.mxu1 %v3345_v50 }
  0xa6   : > { %3056 = vmatprep.mubr.bf16.mxu0 %v381_v24  ;;  %3061 = vmatpush3.bf16.msra.mxu0 %v3329_v22  ;;  %v569_v22 = vand.u32 7, %v539_v11  ;;  %v562_v24 = vand.u32 7, %v538_v13 }
  0xa7   : > { %3062 = vmatprep.subr.bf16.mxu0 %v3332_v30  ;;  %1193 = vmatmul.mubr.bf16.vlgmr.msra.gmra.mxu1 %v3945_v44 }
  0xa8   : > { %2875 = vmatpush3.bf16.msra.mxu1 %v3346_v51  ;;  %vm3974_vm1 = vcmp.ge.s32.totalorder %v569_v22, 1  ;;  %vm3978_vm2 = vcmp.le.s32.totalorder %v562_v24, 6  ;;  %vm3988_vm4 = vcmp.ge.s32.totalorder %v562_v24, 1  ;;  %vm4012_vm8 = vcmp.le.s32.totalorder %v569_v22, 6 }
  0xa9   : > { %2876 = vmatprep.subr.bf16.mxu1 %v3348_v52 }
  0xaa   : > { %3063 = vmatpush3.bf16.msra.mxu0 %v3332_v30 }
  0xab   : > { %3064 = vmatprep.subr.bf16.mxu0 %v3335_v33 }
  0xac   : > { %2877 = vmatpush3.bf16.msra.mxu1 %v3350_v53 }
  0xad   : > { %3057 = vmatmul.mubr.bf16.gmra.mxu0 %v382_v27  ;;  %2878 = vmatprep.subr.bf16.mxu1 %v3360_v54  ;;  %v3968_v27 = vadd.s32 32, %v3961_v5  ;;  %v542_v54 = vadd.s32 48, %v3961_v5 }
  0xae   : > { %3065 = vmatpush3.bf16.msra.mxu0 %v3335_v33  ;;  %3076 = vmatprep.mubr.bf16.mxu0 %v3949_v48 }
  0xaf   : > { %3066 = vmatprep.subr.bf16.mxu0 %v3338_v37  ;;  %v590_v14 = vand.u32 7, %v542_v54 }
  0xb0   : > { %2879 = vmatpush3.bf16.msra.mxu1 %v3361_v55 }
  0xb1   : > { %2880 = vmatprep.subr.bf16.mxu1 %v3368_v56  ;;  %v4002_v56 = vadd.s32 40, %v3961_v5  ;;  %vm654_vm10 = vcmp.le.s32.totalorder %v590_v14, 6  ;;  %vm4033_vm12 = vcmp.ge.s32.totalorder %v590_v14, 1 }
  0xb2   : > { %3067 = vmatpush3.bf16.msra.mxu0 %v3338_v37 }
  0xb3   : > { %3068 = vmatprep.subr.bf16.mxu0 %v3341_v40 }
  0xb4   : > { %2881 = vmatpush3.bf16.msra.mxu1 %v3369_v57 }
  0xb5   : > { %2882 = vmatprep.subr.bf16.mxu1 %v3372_v58 }
  0xb6   : > { %3069 = vmatpush3.bf16.msra.mxu0 %v3341_v40  ;;  %v576_v40 = vand.u32 7, %v3968_v27 }
  0xb7   : > { %3070 = vmatprep.subr.bf16.mxu0 %v3343_v45 }
  0xb8   : > { %2883 = vmatpush3.bf16.msra.mxu1 %v3374_v59  ;;  %vm4008_vm7 = vcmp.ge.s32.totalorder %v576_v40, 1  ;;  %vm4039_vm14 = vcmp.le.s32.totalorder %v576_v40, 6 }
  0xb9   : > { %2884 = vmatprep.subr.bf16.mxu1 %v3378_v60 }
  0xba   : > { %3071 = vmatpush3.bf16.msra.mxu0 %v3343_v45  ;;  %v3410_v45 = vld [vmem:[#allocation9 + $0x208] sm:$0xff]  }
  0xbb   : > { %3072 = vmatprep.subr.bf16.mxu0 %v3344_v46 }
  0xbc   : > { %2885 = vmatpush3.bf16.msra.mxu1 %v3380_v61 }
  0xbd   : > { %2886 = vmatprep.subr.bf16.mxu1 %v3384_v62 }
  0xbe   : > { %3073 = vmatpush3.bf16.msra.mxu0 %v3344_v46 }
  0xbf   : > { %3074 = vmatprep.subr.bf16.mxu0 %v3347_v47 }
  0xc0   : > { %2887 = vmatpush3.bf16.msra.mxu1 %v3385_v63 }
  0xc1   : > { %2888 = vmatprep.subr.bf16.mxu1 %v3388_v0 }
  0xc2   : > { %3075 = vmatpush3.bf16.msra.mxu0 %v3347_v47 }
  0xc3   : > { %3088 = vmatprep.subr.bf16.mxu0 %v3951_v49 }
  0xc4   : > { %2889 = vmatpush3.bf16.msra.mxu1 %v3389_v1 }
  0xc5   : > { %3116 = vmatprep.subr.bf16.mxu1 %v3955_v2 }
 0x165   : > { %v3054_v6 = vpop.f32.mrf.mxu0 }
 0x166   : > { %v495_v7 = vadd.f32 %v3054_v6, %v2615_v4 }
 0x167   : > { %v486_v8 = vpop.f32.mrf.mxu0 }
 0x168   : > { %v519_v9 = vmax.f32 %v495_v7, 0.0  ;;  %v487_v10 = vadd.f32 %v2615_v4, %v486_v8 }
 0x169   : > { %v3055_v12 = vpop.f32.mrf.mxu0 }
 0x16a   : > { %529 = vst [vmem:[#allocation2 + $0x18] sm:$0xff] %v519_v9  ;;  %v2781_v15 = vpack.c.bf16 %v519_v9, %v519_v9  ;;  %v517_v16 = vmax.f32 %v487_v10, 0.0  ;;  %v498_v17 = vadd.f32 %v3055_v12, %v2615_v4 }
 0x16b   : > { %v489_v19 = vpop.f32.mrf.mxu0 }
 0x16c   : > { %802 = vst [vmem:[#allocation3 + $0x34] sm:$0xf] %v2781_v15  ;;  %527 = vst [vmem:[#allocation2 + $0x8] sm:$0xff] %v517_v16  ;;  %v2779_v20 = vpack.c.bf16 %v517_v16, %v517_v16  ;;  %v520_v21 = vmax.f32 %v498_v17, 0.0  ;;  %v490_v23 = vadd.f32 %v2615_v4, %v489_v19  ;;  %v583_v15 = vand.u32 7, %v4002_v56 }
 0x16d   : > { %v3058_v26 = vpop.f32.mrf.mxu0 }
 0x16e   : > { %800 = vst [vmem:[#allocation3 + $0x1c] sm:$0xf] %v2779_v20  ;;  %530 = vst [vmem:[#allocation2 + $0x20] sm:$0xff] %v520_v21  ;;  %v2782_v28 = vpack.c.bf16 %v520_v21, %v520_v21  ;;  %v518_v29 = vmax.f32 %v490_v23, 0.0  ;;  %v511_v30 = vadd.f32 %v3058_v26, %v2615_v4  ;;  %vm645_vm13 = vcmp.ge.s32.totalorder %v583_v15, 1 }
 0x16f   : > { %v502_v32 = vpop.f32.mrf.mxu0  ;;  %vm4043_vm15 = vcmp.le.s32.totalorder %v583_v15, 6  ;;  %v3381_v15 = vld [vmem:[#allocation9 + $0x148] sm:$0xff]  }
 0x170   : > { %803 = vst [vmem:[#allocation3 + $0x40] sm:$0xf] %v2782_v28  ;;  %528 = vst [vmem:[#allocation2 + $0x10] sm:$0xff] %v518_v29  ;;  %v2780_v34 = vpack.c.bf16 %v518_v29, %v518_v29  ;;  %v523_v36 = vmax.f32 %v511_v30, 0.0  ;;  %v503_v37 = vadd.f32 %v2615_v4, %v502_v32 }
 0x171   : > { %v3059_v41 = vpop.f32.mrf.mxu0 }
 0x172   : > { %801 = vst [vmem:[#allocation3 + $0x28] sm:$0xf] %v2780_v34  ;;  %533 = vst [vmem:[#allocation2 + $0x38] sm:$0xff] %v523_v36  ;;  %v2785_v46 = vpack.c.bf16 %v523_v36, %v523_v36  ;;  %v521_v47 = vmax.f32 %v503_v37, 0.0  ;;  %v514_v50 = vadd.f32 %v3059_v41, %v2615_v4 }
 0x173   : > { %v664_v51 = vld [vmem:[#allocation2 + $0x7] sm:$0xff]  ;;  %v505_v55 = vpop.f32.mrf.mxu0 }
 0x174   : > { %v688_v57 = vsel %vm3970_vm0, %v664_v51, 0.0  ;;  %806 = vst [vmem:[#allocation3 + $0x64] sm:$0xf] %v2785_v46  ;;  %531 = vst [vmem:[#allocation2 + $0x28] sm:$0xff] %v521_v47  ;;  %v2783_v58 = vpack.c.bf16 %v521_v47, %v521_v47  ;;  %v524_v59 = vmax.f32 %v514_v50, 0.0  ;;  %v506_v60 = vadd.f32 %v2615_v4, %v505_v55 }
 0x175   : > { %v2771_v61 = vpack.c.bf16 %v688_v57, %v688_v57  ;;  %v667_v62 = vld [vmem:[#allocation2 + $0x1f] sm:$0xff]  ;;  %vm3688_vm0 = vmmov 0  }
 0x176   : > { %v698_v63 = vld [vmem:[#allocation2 + $0x19] sm:$0xff]  ;;  %v691_v6 = vsel %vm3974_vm1, %v667_v62, 0.0  ;;  %804 = vst [vmem:[#allocation3 + $0x4c] sm:$0xf] %v2783_v58  ;;  %534 = vst [vmem:[#allocation2 + $0x40] sm:$0xff] %v524_v59  ;;  %v2786_v7 = vpack.c.bf16 %v524_v59, %v524_v59  ;;  %v522_v8 = vmax.f32 %v506_v60, 0.0 }
 0x177   : > { %v722_v4 = vsel %vm3978_vm2, %v698_v63, 0.0  ;;  %760 = vst [vmem:[#allocation3 + $0x18] sm:$0xf] %v2771_v61  ;;  %v2774_v9 = vpack.c.bf16 %v691_v6, %v691_v6  ;;  %v665_v11 = vld [vmem:[#allocation2 + $0xf] sm:$0xff]  ;;  %v666_v12 = vld [vmem:[#allocation2 + $0x17] sm:$0xff] }
 0x178   : > { %v2789_v10 = vpack.c.bf16 %v722_v4, %v722_v4  ;;  %v696_v13 = vld [vmem:[#allocation2 + $0x9] sm:$0xff]  ;;  %v689_v16 = vsel %vm3982_vm3, %v665_v11, 0.0  ;;  %v690_v17 = vsel %vm3988_vm4, %v666_v12, 0.0  ;;  %v697_v18 = vld [vmem:[#allocation2 + $0x11] sm:$0xff]  ;;  %807 = vst [vmem:[#allocation3 + $0x70] sm:$0xf] %v2786_v7  ;;  %v2784_v20 = vpack.c.bf16 %v522_v8, %v522_v8 }
 0x179   : > { %v720_v19 = vsel %vm3992_vm5, %v696_v13, 0.0  ;;  %532 = vst [vmem:[#allocation2 + $0x30] sm:$0xff] %v522_v8  ;;  %763 = vst [vmem:[#allocation3 + $0x3c] sm:$0xf] %v2774_v9  ;;  %v721_v21 = vsel %vm3996_vm6, %v697_v18, 0.0  ;;  %v2772_v22 = vpack.c.bf16 %v689_v16, %v689_v16  ;;  %v2773_v23 = vpack.c.bf16 %v690_v17, %v690_v17  ;;  %v3358_v60 = vld [vmem:[#allocation9 + $0x170] sm:$0xff]  }
 0x17a   : > { %842 = vst [vmem:[#allocation3 + $0x38] sm:$0xf] %v2789_v10  ;;  %v2787_v24 = vpack.c.bf16 %v720_v19, %v720_v19  ;;  %v2788_v25 = vpack.c.bf16 %v721_v21, %v721_v21  ;;  %805 = vst [vmem:[#allocation3 + $0x58] sm:$0xf] %v2784_v20  ;;  %v4053_v62 = vld [vmem:[#allocation3 + $0x1c] ss:$12 sps:$4 sm:$0xff]  }
 0x17b   : > { %761 = vst [vmem:[#allocation3 + $0x24] sm:$0xf] %v2772_v22  ;;  %762 = vst [vmem:[#allocation3 + $0x30] sm:$0xf] %v2773_v23  ;;  %v668_v26 = vld [vmem:[#allocation2 + $0x27] sm:$0xff]  ;;  %1199 = vmatprep.mubr.bf16.mxu1 %v4053_v62  ;;  %v3377_v13 = vld [vmem:[#allocation9 + $0x150] sm:$0xff]  }
 0x17c   : > { %840 = vst [vmem:[#allocation3 + $0x20] sm:$0xf] %v2787_v24  ;;  %v699_v28 = vld [vmem:[#allocation2 + $0x21] sm:$0xff]  ;;  %841 = vst [vmem:[#allocation3 + $0x2c] sm:$0xf] %v2788_v25  ;;  %v692_v29 = vsel %vm4008_vm7, %v668_v26, 0.0 }
 0x17d   : > { %v723_v30 = vsel %vm4012_vm8, %v699_v28, 0.0  ;;  %v2775_v32 = vpack.c.bf16 %v692_v29, %v692_v29  ;;  %v671_v34 = vld [vmem:[#allocation2 + $0x3f] sm:$0xff]  ;;  %v3362_v6 = vld [vmem:[#allocation9 + $0x168] sm:$0xff]   ;;  %v3390_v20 = vld [vmem:[#allocation9 + $0x1f0] sm:$0xff]  }
 0x17e   : > { %v2790_v33 = vpack.c.bf16 %v723_v30, %v723_v30  ;;  %v702_v36 = vld [vmem:[#allocation2 + $0x39] sm:$0xff]  ;;  %v703_v37 = vld [vmem:[#allocation2 + $0x41] sm:$0xff]  ;;  %v695_v39 = vsel %vm647_vm9, %v671_v34, 0.0  ;;  %v3391_v21 = vld [vmem:[#allocation9 + $0x1b0] sm:$0xff]  }
 0x17f   : > { %v726_v41 = vsel %vm654_vm10, %v702_v36, 0.0  ;;  %v727_v42 = vsel %vm655_vm11, %v703_v37, 0.0  ;;  %764 = vst [vmem:[#allocation3 + $0x48] sm:$0xf] %v2775_v32  ;;  %v2778_v46 = vpack.c.bf16 %v695_v39, %v695_v39  ;;  %v4060_v1 = vld [vmem:[#allocation3 + $0x34] ss:$12 sps:$4 sm:$0xff]   ;;  %v2824_v36 = vpop.f32.mrf.mxu1 }
 0x180   : > { %843 = vst [vmem:[#allocation3 + $0x44] sm:$0xf] %v2790_v33  ;;  %v2793_v47 = vpack.c.bf16 %v726_v41, %v726_v41  ;;  %v2794_v50 = vpack.c.bf16 %v727_v42, %v727_v42  ;;  %v669_v51 = vld [vmem:[#allocation2 + $0x2f] sm:$0xff]  ;;  %v670_v52 = vld [vmem:[#allocation2 + $0x37] sm:$0xff]  ;;  %v3370_v4 = vld [vmem:[#allocation9 + $0x160] sm:$0xff]  }
 0x181   : > { %v700_v53 = vld [vmem:[#allocation2 + $0x29] sm:$0xff]  ;;  %v693_v27 = vsel %vm645_vm13, %v669_v51, 0.0  ;;  %v694_v40 = vsel %vm4033_vm12, %v670_v52, 0.0  ;;  %v701_v54 = vld [vmem:[#allocation2 + $0x31] sm:$0xff]  ;;  %767 = vst [vmem:[#allocation3 + $0x6c] sm:$0xf] %v2778_v46  ;;  %v2825_v38 = vpop.f32.mrf.mxu1 }
 0x182   : > { %v724_v55 = vsel %vm4039_vm14, %v700_v53, 0.0  ;;  %846 = vst [vmem:[#allocation3 + $0x68] sm:$0xf] %v2793_v47  ;;  %847 = vst [vmem:[#allocation3 + $0x74] sm:$0xf] %v2794_v50  ;;  %v725_v56 = vsel %vm4043_vm15, %v701_v54, 0.0  ;;  %v2776_v57 = vpack.c.bf16 %v693_v27, %v693_v27  ;;  %v2777_v58 = vpack.c.bf16 %v694_v40, %v694_v40 }
 0x183   : > { %v2791_v59 = vpack.c.bf16 %v724_v55, %v724_v55  ;;  %v2792_v61 = vpack.c.bf16 %v725_v56, %v725_v56  ;;  %v4055_v63 = vld [vmem:[#allocation3 + $0x20] ss:$12 sps:$4 sm:$0xff]   ;;  %v4057_v0 = vld [vmem:[#allocation3 + $0x18] ss:$12 sps:$4 sm:$0xff]   ;;  %v4069_v7 = vld [vmem:[#allocation3 + $0x30] ss:$12 sps:$4 sm:$0xff]   ;;  %v2827_v52 = vpop.f32.mrf.mxu1 }
 0x184   : > { %765 = vst [vmem:[#allocation3 + $0x54] sm:$0xf] %v2776_v57  ;;  %766 = vst [vmem:[#allocation3 + $0x60] sm:$0xf] %v2777_v58  ;;  %3077 = vmatmul.mubr.bf16.vlgmr.msra.gmra.mxu0 %v4055_v63  ;;  %1200 = vmatmul.mubr.bf16.gmra.mxu1 %v4057_v0  ;;  %v4075_v10 = vld [vmem:[#allocation3 + $0x4c] ss:$12 sps:$4 sm:$0xff]  }
 0x185   : > { %844 = vst [vmem:[#allocation3 + $0x50] sm:$0xf] %v2791_v59  ;;  %845 = vst [vmem:[#allocation3 + $0x5c] sm:$0xf] %v2792_v61  ;;  %3089 = vmatpush3.bf16.msra.mxu0 %v3951_v49  ;;  %1207 = vmatprep.mubr.bf16.mxu1 %v4060_v1  ;;  %v3371_v49 = vld [vmem:[#allocation9 + $0x158] sm:$0xff]   ;;  %v3383_v17 = vld [vmem:[#allocation9 + $0x140] sm:$0xff]  }
 0x186   : > { %3090 = vmatprep.subr.bf16.mxu0 %v3358_v60  ;;  %v4081_v11 = vld [vmem:[#allocation3 + $0x80] ss:$12 sps:$4 sm:$0xff]   ;;  %v4085_v14 = vld [vmem:[#allocation3 + $0x64] ss:$12 sps:$4 sm:$0xff]   ;;  %v3392_v22 = vld [vmem:[#allocation9 + $0x1e8] sm:$0xff]  }
 0x187   : > { %v4066_v3 = vld [vmem:[#allocation3 + $0x38] ss:$12 sps:$4 sm:$0xff]   ;;  %v3386_v18 = vld [vmem:[#allocation9 + $0x1f8] sm:$0xff]   ;;  %v3395_v24 = vld [vmem:[#allocation9 + $0x1e0] sm:$0xff]  }
 0x188   : > { %3080 = vmatprep.mubr.bf16.mxu0 %v4066_v3  ;;  %v3387_v19 = vld [vmem:[#allocation9 + $0x1b8] sm:$0xff]   ;;  %v3393_v23 = vld [vmem:[#allocation9 + $0x1a8] sm:$0xff]   ;;  %v3397_v25 = vld [vmem:[#allocation9 + $0x230] sm:$0xff]  }
 0x189   : > { %3091 = vmatpush3.bf16.msra.mxu0 %v3358_v60  ;;  %v4073_v9 = vld [vmem:[#allocation3 + $0x68] ss:$12 sps:$4 sm:$0xff]   ;;  %v3402_v29 = vld [vmem:[#allocation9 + $0x228] sm:$0xff]   ;;  %v3409_v41 = vld [vmem:[#allocation9 + $0x210] sm:$0xff]  }
 0x18a   : > { %3092 = vmatprep.subr.bf16.mxu0 %v3362_v6  ;;  %v3396_v26 = vld [vmem:[#allocation9 + $0x1a0] sm:$0xff]   ;;  %v3398_v28 = vld [vmem:[#allocation9 + $0x1d8] sm:$0xff]   ;;  %v3403_v33 = vld [vmem:[#allocation9 + $0x1c8] sm:$0xff]  }
 0x18b   : > { %v4083_v12 = vld [vmem:[#allocation3 + $0x48] ss:$12 sps:$4 sm:$0xff]   ;;  %v4091_v16 = vld [vmem:[#allocation3 + $0x60] ss:$12 sps:$4 sm:$0xff]   ;;  %v3404_v37 = vld [vmem:[#allocation9 + $0x188] sm:$0xff]  }
 0x18c   : > { %v4071_v8 = vld [vmem:[#allocation3 + $0x50] ss:$12 sps:$4 sm:$0xff]   ;;  %1208 = vmatmul.mubr.bf16.gmra.mxu1 %v4069_v7  ;;  %v3399_v30 = vld [vmem:[#allocation9 + $0x198] sm:$0xff]   ;;  %v3413_v47 = vld [vmem:[#allocation10 + $0x30] sm:$0xff]  }
 0x18d   : > { %3081 = vmatmul.mubr.bf16.gmra.mxu0 %v4071_v8  ;;  %1215 = vmatprep.mubr.bf16.mxu1 %v4075_v10  ;;  %v3405_v32 = vld [vmem:[#allocation9 + $0x220] sm:$0xff]   ;;  %v3408_v34 = vld [vmem:[#allocation9 + $0x218] sm:$0xff]   ;;  %v3414_v50 = vld [vmem:[#allocation10 + $0x28] sm:$0xff]  }
 0x18e   : > { %3093 = vmatpush3.bf16.msra.mxu0 %v3362_v6  ;;  %3084 = vmatprep.mubr.bf16.mxu0 %v4073_v9  ;;  %v3406_v39 = vld [vmem:[#allocation9 + $0x1c0] sm:$0xff]   ;;  %v3417_v40 = vld [vmem:[#allocation10 + $0x10] sm:$0xff]   ;;  %v3418_v56 = vld [vmem:[#allocation10 + $0x8] sm:$0xff]  }
 0x18f   : > { %3094 = vmatprep.subr.bf16.mxu0 %v3370_v4  ;;  %v3407_v42 = vld [vmem:[#allocation9 + $0x180] sm:$0xff]   ;;  %v3424_v36 = vld [vmem:[#allocation12 + $0x18] sm:$0xff]  }
 0x190   : > { %v3411_v46 = vld [vmem:[#allocation9 + $0x200] sm:$0xff]  }
 0x191   : > { %v3415_v51 = vld [vmem:[#allocation10 + $0x20] sm:$0xff]  }
 0x192   : > { %3095 = vmatpush3.bf16.msra.mxu0 %v3370_v4 }
 0x193   : > { %3096 = vmatprep.subr.bf16.mxu0 %v3371_v49 }
 0x194   : > { %1216 = vmatmul.mubr.bf16.gmra.mxu1 %v4083_v12 }
 0x195   : > { %3085 = vmatmul.mubr.bf16.gmra.mxu0 %v4081_v11  ;;  %1223 = vmatprep.mubr.bf16.mxu1 %v4085_v14 }
 0x196   : > { %3097 = vmatpush3.bf16.msra.mxu0 %v3371_v49  ;;  %3104 = vmatprep.mubr.bf16.mxu0 %v3949_v48 }
 0x197   : > { %3098 = vmatprep.subr.bf16.mxu0 %v3377_v13 }
 0x19a   : > { %3099 = vmatpush3.bf16.msra.mxu0 %v3377_v13 }
 0x19b   : > { %3100 = vmatprep.subr.bf16.mxu0 %v3381_v15 }
 0x19c   : > { %1224 = vmatmul.mubr.bf16.gmra.mxu1 %v4091_v16 }
 0x19d   : > { %1230 = vmatprep.mubr.bf16.mxu1 %v3943_v43 }
 0x19e   : > { %3101 = vmatpush3.bf16.msra.mxu0 %v3381_v15 }
 0x19f   : > { %3102 = vmatprep.subr.bf16.mxu0 %v3383_v17 }
 0x1a2   : > { %3103 = vmatpush3.bf16.msra.mxu0 %v3383_v17 }
 0x1a3   : > { %2940 = vmatprep.subr.bf16.mxu0 %v3386_v18 }
 0x1a4   : > { %1231 = vmatmul.mubr.bf16.gmra.mxu1 %v3945_v44 }
 0x1a5   : > { %3105 = vmatmul.mubr.bf16.vlgmr.msra.gmra.mxu0 %v4055_v63  ;;  %1539 = vmatprep.mubr.bf16.mxu1 %v3943_v43 }
 0x1a6   : > { %3108 = vmatprep.mubr.bf16.mxu0 %v4066_v3  ;;  %2941 = vmatpush3.bf16.msra.mxu0 %v3387_v19 }
 0x1a7   : > { %2942 = vmatprep.subr.bf16.mxu0 %v3390_v20 }
 0x1aa   : > { %2943 = vmatpush3.bf16.msra.mxu0 %v3391_v21 }
 0x1ab   : > { %2944 = vmatprep.subr.bf16.mxu0 %v3392_v22 }
 0x1ac   : > { %1540 = vmatmul.mubr.bf16.vlgmr.msra.gmra.mxu1 %v3945_v44 }
 0x1ad   : > { %3109 = vmatmul.mubr.bf16.gmra.mxu0 %v4071_v8  ;;  %3117 = vmatpush3.bf16.msra.mxu1 %v3955_v2  ;;  %v3401_v2 = vld [vmem:[#allocation9 + $0x190] sm:$0xff]  }
 0x1ae   : > { %3112 = vmatprep.mubr.bf16.mxu0 %v4073_v9  ;;  %2945 = vmatpush3.bf16.msra.mxu0 %v3393_v23  ;;  %v3422_v23 = vld [vmem:[#allocation12 + $0x28] sm:$0xff]  }
 0x1af   : > { %1545 = vmatprep.mubr.bf16.mxu1 %v4053_v62  ;;  %2946 = vmatprep.subr.bf16.mxu0 %v3395_v24 }
 0x1b0   : > { %3118 = vmatprep.subr.bf16.mxu1 %v3397_v25 }
 0x1b1   : > { %3119 = vmatpush3.bf16.msra.mxu1 %v3397_v25 }
 0x1b2   : > { %2947 = vmatpush3.bf16.msra.mxu0 %v3396_v26  ;;  %3120 = vmatprep.subr.bf16.mxu1 %v3402_v29 }
 0x1b3   : > { %2948 = vmatprep.subr.bf16.mxu0 %v3398_v28 }
 0x1b4   : > { %1546 = vmatmul.mubr.bf16.gmra.mxu1 %v4057_v0 }
 0x1b5   : > { %3113 = vmatmul.mubr.bf16.gmra.mxu0 %v4081_v11  ;;  %1553 = vmatprep.mubr.bf16.mxu1 %v4060_v1 }
 0x1b6   : > { %2949 = vmatpush3.bf16.msra.mxu0 %v3399_v30  ;;  %3121 = vmatpush3.bf16.msra.mxu1 %v3402_v29 }
 0x1b7   : > { %2950 = vmatprep.subr.bf16.mxu0 %v3400_v31  ;;  %3122 = vmatprep.subr.bf16.mxu1 %v3405_v32  ;;  %v3423_v31 = vld [vmem:[#allocation12 + $0x20] sm:$0xff]  }
 0x1b8   : > { %1886 = vmatprep.mubr.bf16.mxu0 %v3943_v43 }
 0x1ba   : > { %2951 = vmatpush3.bf16.msra.mxu0 %v3401_v2  ;;  %3123 = vmatpush3.bf16.msra.mxu1 %v3405_v32 }
 0x1bb   : > { %2952 = vmatprep.subr.bf16.mxu0 %v3403_v33  ;;  %3124 = vmatprep.subr.bf16.mxu1 %v3408_v34 }
 0x1bc   : > { %1554 = vmatmul.mubr.bf16.gmra.mxu1 %v4069_v7 }
 0x1bd   : > { %1561 = vmatprep.mubr.bf16.mxu1 %v4075_v10 }
 0x1be   : > { %2953 = vmatpush3.bf16.msra.mxu0 %v3404_v37  ;;  %3125 = vmatpush3.bf16.msra.mxu1 %v3408_v34 }
 0x1bf   : > { %2954 = vmatprep.subr.bf16.mxu0 %v3406_v39  ;;  %3126 = vmatprep.subr.bf16.mxu1 %v3409_v41 }
 0x1c2   : > { %2955 = vmatpush3.bf16.msra.mxu0 %v3407_v42  ;;  %3127 = vmatpush3.bf16.msra.mxu1 %v3409_v41  ;;  %v3425_v42 = vld [vmem:[#allocation12 + $0x10] sm:$0xff]  }
 0x1c3   : > { %3164 = vmatprep.subr.bf16.mxu0 %v3686_v35  ;;  %3128 = vmatprep.subr.bf16.mxu1 %v3410_v45 }
 0x1c4   : > { %1562 = vmatmul.mubr.bf16.gmra.mxu1 %v4083_v12 }
 0x1c5   : > { %1887 = vmatmul.mubr.bf16.vlgmr.msra.gmra.mxu0 %v3945_v44  ;;  %1569 = vmatprep.mubr.bf16.mxu1 %v4085_v14 }
 0x1c6   : > { %1892 = vmatprep.mubr.bf16.mxu0 %v4053_v62  ;;  %3129 = vmatpush3.bf16.msra.mxu1 %v3410_v45 }
 0x1c7   : > { %3130 = vmatprep.subr.bf16.mxu1 %v3411_v46 }
 0x1ca   : > { %3131 = vmatpush3.bf16.msra.mxu1 %v3411_v46 }
 0x1cb   : > { %3144 = vmatprep.subr.bf16.mxu1 %v3686_v35 }
 0x1cc   : > { %1570 = vmatmul.mubr.bf16.gmra.mxu1 %v4091_v16 }
 0x1cd   : > { %1893 = vmatmul.mubr.bf16.gmra.mxu0 %v4057_v0  ;;  %1577 = vmatprep.mubr.bf16.mxu1 %v3943_v43  ;;  %v3419_v0 = vld [vmem:[#allocation10] sm:$0xff]  }
 0x1ce   : > { %1899 = vmatprep.mubr.bf16.mxu0 %v4060_v1 }
 0x1d4   : > { %1578 = vmatmul.mubr.bf16.gmra.mxu1 %v3945_v44 }
 0x1d5   : > { %1900 = vmatmul.mubr.bf16.gmra.mxu0 %v4069_v7  ;;  %3132 = vmatprep.mubr.bf16.mxu1 %v3949_v48  ;;  %v3412_v48 = vld [vmem:[#allocation10 + $0x38] sm:$0xff]  }
 0x1d6   : > { %1907 = vmatprep.mubr.bf16.mxu0 %v4075_v10 }
 0x1dc   : > { %3133 = vmatmul.mubr.bf16.vlgmr.msra.gmra.mxu1 %v4055_v63 }
 0x1dd   : > { %1908 = vmatmul.mubr.bf16.gmra.mxu0 %v4083_v12  ;;  %3136 = vmatprep.mubr.bf16.mxu1 %v4066_v3  ;;  %v3420_v12 = vld [vmem:[#allocation12 + $0x38] sm:$0xff]  }
 0x1de   : > { %1915 = vmatprep.mubr.bf16.mxu0 %v4085_v14  ;;  %3145 = vmatpush3.bf16.msra.mxu1 %v3412_v48 }
 0x1df   : > { %3146 = vmatprep.subr.bf16.mxu1 %v3686_v35  ;;  %3165 = vmatpush3.bf16.msra.mxu0 %v3420_v12 }
 0x1e0   : > { %3166 = vmatprep.subr.bf16.mxu0 %v3686_v35 }
 0x1e2   : > { %3147 = vmatpush3.bf16.msra.mxu1 %v3413_v47 }
 0x1e3   : > { %3148 = vmatprep.subr.bf16.mxu1 %v3686_v35 }
 0x1e4   : > { %3137 = vmatmul.mubr.bf16.gmra.mxu1 %v4071_v8 }
 0x1e5   : > { %1916 = vmatmul.mubr.bf16.gmra.mxu0 %v4091_v16  ;;  %3140 = vmatprep.mubr.bf16.mxu1 %v4073_v9  ;;  %v3421_v16 = vld [vmem:[#allocation12 + $0x30] sm:$0xff]  }
 0x1e6   : > { %1923 = vmatprep.mubr.bf16.mxu0 %v3943_v43  ;;  %3149 = vmatpush3.bf16.msra.mxu1 %v3414_v50  ;;  %v3416_v43 = vld [vmem:[#allocation10 + $0x18] sm:$0xff]   ;;  %v3426_v50 = vld [vmem:[#allocation12 + $0x8] sm:$0xff]  }
 0x1e7   : > { %3150 = vmatprep.subr.bf16.mxu1 %v3686_v35  ;;  %3167 = vmatpush3.bf16.msra.mxu0 %v3421_v16 }
 0x1e8   : > { %3168 = vmatprep.subr.bf16.mxu0 %v3686_v35 }
 0x1ea   : > { %3151 = vmatpush3.bf16.msra.mxu1 %v3415_v51 }
 0x1eb   : > { %3152 = vmatprep.subr.bf16.mxu1 %v3686_v35  ;;  %3169 = vmatpush3.bf16.msra.mxu0 %v3422_v23 }
 0x1ec   : > { %3141 = vmatmul.mubr.bf16.gmra.mxu1 %v4081_v11  ;;  %3170 = vmatprep.subr.bf16.mxu0 %v3686_v35 }
 0x1ed   : > { %1924 = vmatmul.mubr.bf16.gmra.mxu0 %v3945_v44  ;;  %v2828_v44 = vpop.f32.mrf.mxu1  ;;  %3160 = vmatprep.mubr.msk.bf16.mxu1 %vm3688_vm0, %v3686_v35 }
 0x1ee   : > { %3153 = vmatpush3.bf16.msra.mxu1 %v3416_v43  ;;  %3180 = vmatprep.mubr.msk.bf16.mxu0 %vm3688_vm0, %v3686_v35  ;;  %v2829_v60 = vadd.f32 %v2828_v44, %v2827_v52 }
 0x1ef   : > { %3154 = vmatprep.subr.bf16.mxu1 %v3686_v35  ;;  %3171 = vmatpush3.bf16.msra.mxu0 %v3423_v31 }
 0x1f0   : > { %3172 = vmatprep.subr.bf16.mxu0 %v3686_v35 }
 0x1f2   : > { %3155 = vmatpush3.bf16.msra.mxu1 %v3417_v40 }
 0x1f3   : > { %3156 = vmatprep.subr.bf16.mxu1 %v3686_v35  ;;  %3173 = vmatpush3.bf16.msra.mxu0 %v3424_v36 }
 0x1f4   : > { %3174 = vmatprep.subr.bf16.mxu0 %v3686_v35 }
 0x1f6   : > { %3157 = vmatpush3.bf16.msra.mxu1 %v3418_v56 }
 0x1f7   : > { %3158 = vmatprep.subr.bf16.mxu1 %v3686_v35  ;;  %3175 = vmatpush3.bf16.msra.mxu0 %v3425_v42 }
 0x1f8   : > { %3176 = vmatprep.subr.bf16.mxu0 %v3686_v35 }
 0x1fa   : > { %3159 = vmatpush3.bf16.msra.mxu1 %v3419_v0 }
 0x1fb   : > { %3177 = vmatpush3.bf16.msra.mxu0 %v3426_v50 }
 0x1fc   : > { %3178 = vmatprep.subr.bf16.mxu0 %v3686_v35 }
 0x244   : > { %v3078_v53 = vpop.f32.mrf.mxu0  ;;  %v2830_v27 = vpop.f32.mrf.mxu1 }
 0x246   : > { %v1271_v54 = vpop.f32.mrf.mxu0  ;;  %v2831_v55 = vpop.f32.mrf.mxu1 }
 0x247   : > { %v2832_v57 = vadd.f32 %v2831_v55, %v2830_v27 }
 0x248   : > { %v3079_v58 = vpop.f32.mrf.mxu0  ;;  %v2833_v59 = vpop.f32.mrf.mxu1 }
 0x249   : > { %v4142_v61 = vadd.f32 %v3078_v53, %v2832_v57 }
 0x24a   : > { %v1273_v62 = vpop.f32.mrf.mxu0  ;;  %v2834_v63 = vpop.f32.mrf.mxu1 }
 0x24b   : > { %v4144_v1 = vadd.f32 %v2829_v60, %v1273_v62  ;;  %v2835_v3 = vadd.f32 %v2834_v63, %v2833_v59 }
 0x24c   : > { %v2836_v4 = vpop.f32.mrf.mxu1 }
 0x24d   : > { %v3082_v6 = vpop.f32.mrf.mxu0  ;;  %v4147_v7 = vadd.f32 %v3079_v58, %v2835_v3 }
 0x24e   : > { %v2837_v9 = vpop.f32.mrf.mxu1 }
 0x24f   : > { %v1286_v8 = vpop.f32.mrf.mxu0  ;;  %v2838_v10 = vadd.f32 %v2837_v9, %v2836_v4 }
 0x250   : > { %v2839_v11 = vpop.f32.mrf.mxu1 }
 0x251   : > { %v3083_v49 = vpop.f32.mrf.mxu0  ;;  %v4149_v13 = vadd.f32 %v2838_v10, %v1286_v8 }
 0x252   : > { %v2840_v15 = vpop.f32.mrf.mxu1 }
 0x253   : > { %v1289_v14 = vpop.f32.mrf.mxu0  ;;  %v2841_v17 = vadd.f32 %v2840_v15, %v2839_v11 }
 0x254   : > { %v2842_v18 = vpop.f32.mrf.mxu1 }
 0x255   : > { %v3086_v19 = vpop.f32.mrf.mxu0  ;;  %v4152_v20 = vadd.f32 %v2841_v17, %v1289_v14 }
 0x256   : > { %v2843_v21 = vpop.f32.mrf.mxu1 }
 0x257   : > { %v1302_v22 = vpop.f32.mrf.mxu0  ;;  %v2844_v24 = vadd.f32 %v2843_v21, %v2842_v18 }
 0x258   : > { %v2845_v25 = vpop.f32.mrf.mxu1 }
 0x259   : > { %v3087_v26 = vpop.f32.mrf.mxu0  ;;  %v4155_v28 = vadd.f32 %v3082_v6, %v2844_v24 }
 0x25a   : > { %v2846_v29 = vpop.f32.mrf.mxu1 }
 0x25b   : > { %v1305_v30 = vpop.f32.mrf.mxu0  ;;  %v2847_v32 = vadd.f32 %v2846_v29, %v2845_v25 }
 0x25c   : > { %v2848_v2 = vpop.f32.mrf.mxu1 }
 0x25d   : > { %v4158_v33 = vadd.f32 %v3083_v49, %v2847_v32 }
 0x25e   : > { %v2849_v34 = vpop.f32.mrf.mxu1 }
 0x25f   : > { %v2850_v37 = vadd.f32 %v2849_v34, %v2848_v2 }
 0x260   : > { %v2851_v38 = vpop.f32.mrf.mxu1 }
 0x261   : > { %v4161_v39 = vadd.f32 %v2850_v37, %v1302_v22 }
 0x262   : > { %v2852_v41 = vpop.f32.mrf.mxu1 }
 0x264   : > { %v2854_v46 = vpop.f32.mrf.mxu1 }
 0x265   : > { %v3106_v45 = vpop.f32.mrf.mxu0 }
 0x266   : > { %v2855_v47 = vpop.f32.mrf.mxu1 }
 0x267   : > { %v1618_v48 = vpop.f32.mrf.mxu0 }
 0x268   : > { %v2857_v52 = vpop.f32.mrf.mxu1 }
 0x269   : > { %v4165_v51 = vpop.f32.mrf.mxu0 }
 0x26a   : > { %v2858_v44 = vpop.f32.mrf.mxu1 }
 0x26b   : > { %v1620_v43 = vpop.f32.mrf.mxu0 }
 0x26c   : > { %v2890_v27 = vpop.f32.mrf.mxu1 }
 0x26d   : > { %v3110_v53 = vpop.f32.mrf.mxu0 }
 0x26e   : > { %v2891_v54 = vpop.f32.mrf.mxu1 }
 0x26f   : > { %v4168_v40 = vpop.f32.mrf.mxu0 }
 0x270   : > { %v2893_v56 = vpop.f32.mrf.mxu1 }
 0x271   : > { %v4170_v55 = vpop.f32.mrf.mxu0 }
 0x272   : > { %v2894_v58 = vpop.f32.mrf.mxu1 }
 0x273   : > { %v1635_v57 = vpop.f32.mrf.mxu0 }
 0x274   : > { %v2896_v59 = vpop.f32.mrf.mxu1 }
 0x275   : > { %v3114_v60 = vpop.f32.mrf.mxu0 }
 0x276   : > { %v2897_v62 = vpop.f32.mrf.mxu1 }
 0x277   : > { %v4172_v63 = vpop.f32.mrf.mxu0  ;;  %v2898_v0 = vadd.f32 %v2897_v62, %v2896_v59 }
 0x278   : > { %v2899_v3 = vpop.f32.mrf.mxu1 }
 0x279   : > { %v3115_v6 = vpop.f32.mrf.mxu0  ;;  %v1625_v4 = vadd.f32 %v3106_v45, %v2898_v0 }
 0x27a   : > { %v2900_v35 = vpop.f32.mrf.mxu1 }
 0x27b   : > { %v2008_v8 = vadd.f32 %v1625_v4, %v4144_v1  ;;  %v4175_v11 = vpop.f32.mrf.mxu0  ;;  %v2901_v43 = vadd.f32 %v2900_v35, %v2899_v3 }
 0x27c   : > { %v2902_v9 = vpop.f32.mrf.mxu1 }
 0x27d   : > { %v1628_v59 = vadd.f32 %v4165_v51, %v2901_v43 }
 0x27e   : > { %v2903_v10 = vpop.f32.mrf.mxu1 }
 0x27f   : > { %v2904_v60 = vadd.f32 %v2903_v10, %v2902_v9  ;;  %v2009_v3 = vadd.f32 %v1628_v59, %v4142_v61  ;;  %v2738_v9 = vld [vmem:[%s4337_s6 + $0x1] ss:$0 sm:$0xff] }
 0x280   : > { %v2905_v49 = vpop.f32.mrf.mxu1 }
 0x281   : > { %v1633_v35 = vadd.f32 %v2904_v60, %v4168_v40 }
 0x282   : > { %v2906_v12 = vpop.f32.mrf.mxu1 }
 0x283   : > { %v2907_v27 = vadd.f32 %v2906_v12, %v2905_v49 }
 0x284   : > { %v2908_v15 = vpop.f32.mrf.mxu1 }
 0x285   : > { %v2956_v14 = vpop.f32.mrf.mxu0 }
 0x286   : > { %v2909_v17 = vpop.f32.mrf.mxu1  ;;  %v1636_v14 = vadd.f32 %v2907_v27, %v1635_v57 }
 0x287   : > { %v2957_v16 = vpop.f32.mrf.mxu0  ;;  %v2910_v18 = vadd.f32 %v2909_v17, %v2908_v15 }
 0x288   : > { %v2911_v21 = vpop.f32.mrf.mxu1 }
 0x289   : > { %v2959_v19 = vpop.f32.mrf.mxu0  ;;  %v1641_v22 = vadd.f32 %v3110_v53, %v2910_v18 }
 0x28a   : > { %v2912_v24 = vpop.f32.mrf.mxu1 }
 0x28b   : > { %v2960_v23 = vpop.f32.mrf.mxu0  ;;  %v4178_v25 = vadd.f32 %v1641_v22, %v4152_v20  ;;  %v2913_v18 = vadd.f32 %v2912_v24, %v2911_v21 }
 0x28c   : > { %v2914_v26 = vpop.f32.mrf.mxu1 }
 0x28d   : > { %v2962_v1 = vpop.f32.mrf.mxu0  ;;  %v1644_v61 = vadd.f32 %v4170_v55, %v2913_v18 }
 0x28e   : > { %v2915_v30 = vpop.f32.mrf.mxu1 }
 0x28f   : > { %v2963_v29 = vpop.f32.mrf.mxu0  ;;  %v2916_v40 = vadd.f32 %v2915_v30, %v2914_v26 }
 0x290   : > { %v2917_v32 = vpop.f32.mrf.mxu1  ;;  %v2011_v29 = vadd.f32 %v1636_v14, %v4149_v13 }
 0x291   : > { %v2965_v31 = vpop.f32.mrf.mxu0  ;;  %v1649_v30 = vadd.f32 %v2916_v40, %v4172_v63 }
 0x292   : > { %v2918_v34 = vpop.f32.mrf.mxu1 }
 0x293   : > { %v2966_v2 = vpop.f32.mrf.mxu0  ;;  %v2919_v57 = vadd.f32 %v2918_v34, %v2917_v32  ;;  %v2014_v60 = vadd.f32 %v1649_v30, %v4158_v33  ;;  %v3435_v30 = vld [vmem:[#allocation13] sm:$0xff]  }
 0x294   : > { %v2920_v37 = vpop.f32.mrf.mxu1  ;;  %v2967_v54 = vadd.f32 %v2966_v2, %v2965_v31 }
 0x295   : > { %v2968_v36 = vpop.f32.mrf.mxu0  ;;  %v1652_v34 = vadd.f32 %v2919_v57, %v4175_v11 }
 0x296   : > { %v2921_v41 = vpop.f32.mrf.mxu1 }
 0x297   : > { %v2969_v38 = vpop.f32.mrf.mxu0  ;;  %v2010_v41 = vadd.f32 %v1633_v35, %v4147_v7 }
 0x298   : > { %v2923_v45 = vpop.f32.mrf.mxu1  ;;  %v2970_v4 = vadd.f32 %v2969_v38, %v2968_v36 }
 0x299   : > { %v2971_v42 = vpop.f32.mrf.mxu0 }
 0x29a   : > { %v2924_v48 = vpop.f32.mrf.mxu1 }
 0x29b   : > { %v2972_v46 = vpop.f32.mrf.mxu0 }
 0x29c   : > { %v3134_v50 = vpop.f32.mrf.mxu1  ;;  %v2973_v1 = vadd.f32 %v2972_v46, %v2971_v42 }
 0x29d   : > { %v2974_v47 = vpop.f32.mrf.mxu0  ;;  %v2013_v50 = vadd.f32 %v1644_v61, %v4155_v28 }
 0x29e   : > { %v1965_v52 = vpop.f32.mrf.mxu1 }
 0x29f   : > { %v2975_v20 = vpop.f32.mrf.mxu0 }
 0x2a0   : > { %v3135_v53 = vpop.f32.mrf.mxu1  ;;  %v2976_v15 = vadd.f32 %v2975_v20, %v2974_v47 }
 0x2a1   : > { %v2977_v44 = vpop.f32.mrf.mxu0  ;;  %v1974_v62 = vadd.f32 %v3135_v53, %v2967_v54  ;;  %v2015_v54 = vadd.f32 %v1652_v34, %v4161_v39  ;;  %v3430_v34 = vld [vmem:[#allocation13 + $0x28] sm:$0xff]  }
 0x2a2   : > { %v1967_v58 = vpop.f32.mrf.mxu1 }
 0x2a3   : > { %v2978_v56 = vpop.f32.mrf.mxu0  ;;  %v2016_v12 = vadd.f32 %v2008_v8, %v1974_v62 }
 0x2a4   : > { %v3138_v6 = vpop.f32.mrf.mxu1  ;;  %v2979_v49 = vadd.f32 %v2978_v56, %v2977_v44 }
 0x2a5   : > { %v2980_v0 = vpop.f32.mrf.mxu0  ;;  %v1987_v22 = vadd.f32 %v3138_v6, %v2976_v15  ;;  %v4190_v8 = vadd.f32 %v2738_v9, %v2016_v12 }
 0x2a6   : > { %v1978_v17 = vpop.f32.mrf.mxu1 }
 0x2a7   : > { %v2981_v16 = vpop.f32.mrf.mxu0  ;;  %v1979_v19 = vadd.f32 %v2970_v4, %v1978_v17  ;;  %v2019_v36 = vadd.f32 %v2011_v29, %v1987_v22  ;;  %v2037_v20 = vmax.f32 %v4190_v8, 0.0 }
 0x2a8   : > { %v3139_v51 = vpop.f32.mrf.mxu1  ;;  %v2982_v32 = vadd.f32 %v2981_v16, %v2980_v0 }
 0x2a9   : > { %v2983_v23 = vpop.f32.mrf.mxu0  ;;  %v2017_v10 = vadd.f32 %v2009_v3, %v1979_v19  ;;  %v1990_v24 = vadd.f32 %v3139_v51, %v2979_v49  ;;  %v4199_v7 = vadd.f32 %v2738_v9, %v2019_v36 }
 0x2aa   : > { %v1981_v31 = vpop.f32.mrf.mxu1 }
 0x2ab   : > { %v2984_v21 = vpop.f32.mrf.mxu0  ;;  %v4188_v2 = vadd.f32 %v2738_v9, %v2017_v10  ;;  %v1982_v38 = vadd.f32 %v2973_v1, %v1981_v31  ;;  %v2020_v42 = vadd.f32 %v4178_v25, %v1990_v24  ;;  %v2040_v62 = vmax.f32 %v4199_v7, 0.0  ;;  %v2077_v24 = vld [vmem:[%s4337_s6 + $0x2] sm:$0x1] }
 0x2ac   : > { %v3142_v45 = vpop.f32.mrf.mxu1  ;;  %v2985_v44 = vadd.f32 %v2984_v21, %v2983_v23  ;;  %v3427_v21 = vld [vmem:[#allocation12] sm:$0xff]  }
 0x2ad   : > { %v2986_v37 = vpop.f32.mrf.mxu0  ;;  %v2038_v13 = vmax.f32 %v4188_v2, 0.0  ;;  %v2018_v46 = vadd.f32 %v2010_v41, %v1982_v38  ;;  %v4207_v27 = vadd.f32 %v2738_v9, %v2020_v42  ;;  %3179 = vmatpush3.bf16.msra.mxu0 %v3427_v21  ;;  %v3431_v42 = vld [vmem:[#allocation13 + $0x20] sm:$0xff]  }
 0x2ae   : > { %v1994_v26 = vpop.f32.mrf.mxu1 }
 0x2af   : > { %v2987_v55 = vpop.f32.mrf.mxu0  ;;  %v1995_v47 = vadd.f32 %v2982_v32, %v1994_v26  ;;  %v4201_v52 = vadd.f32 %v2738_v9, %v2018_v46  ;;  %v2045_v63 = vadd.f32 %v2038_v13, %v2037_v20  ;;  %v2041_v15 = vmax.f32 %v4207_v27, 0.0  ;;  %v3429_v32 = vld [vmem:[#allocation13 + $0x30] sm:$0xff]   ;;  %v3432_v46 = vld [vmem:[#allocation13 + $0x18] sm:$0xff]   ;;  %v3434_v26 = vld [vmem:[#allocation13 + $0x8] sm:$0xff]  }
 0x2b0   : > { %v2988_v48 = vadd.f32 %v2987_v55, %v2986_v37  ;;  %v3143_v43 = vpop.f32.mrf.mxu1  ;;  %v3433_v55 = vld [vmem:[#allocation13 + $0x10] sm:$0xff]  }
 0x2b1   : > { %v2989_v11 = vpop.f32.mrf.mxu0  ;;  %v2021_v25 = vadd.f32 %v2013_v50, %v1995_v47  ;;  %v2039_v28 = vmax.f32 %v4201_v52, 0.0  ;;  %v2756_v52 = vld [vmem:[%s4337_s6 + $0x4] ss:$0 sm:$0xff] }
 0x2b2   : > { %v2003_v53 = vadd.f32 %v3142_v45, %v2988_v48  ;;  %v1997_v58 = vpop.f32.mrf.mxu1  ;;  %v3428_v45 = vld [vmem:[#allocation13 + $0x38] sm:$0xff]   ;;  %v2184_v48 = vld [vmem:[%s4337_s6 + $0x3] sm:$0x1] }
 0x2b3   : > { %v2990_v56 = vpop.f32.mrf.mxu0  ;;  %v1998_v59 = vadd.f32 %v2985_v44, %v1997_v58  ;;  %v2046_v0 = vadd.f32 %v2045_v63, %v2039_v28  ;;  %v4215_v4 = vadd.f32 %v2738_v9, %v2021_v25  ;;  %3184 = vmatprep.subr.bf16.mxu1 %v3428_v45 }
 0x2b4   : > { %v2023_v6 = vadd.f32 %v2015_v54, %v2003_v53  ;;  %v2281_v54 = vsub.s32 0, %v3961_v5 }
 0x2b5   : > { %v2022_v14 = vadd.f32 %v2014_v60, %v1998_v59  ;;  %v2047_v16 = vadd.f32 %v2046_v0, %v2040_v62  ;;  %v2042_v33 = vmax.f32 %v4215_v4, 0.0 }
 0x2b6   : > { %v4222_v17 = vadd.f32 %v2738_v9, %v2023_v6 }
 0x2b7   : > { %v4220_v39 = vadd.f32 %v2738_v9, %v2022_v14  ;;  %v2048_v18 = vadd.f32 %v2047_v16, %v2041_v15 }
 0x2b8   : > { %v2044_v35 = vmax.f32 %v4222_v17, 0.0 }
 0x2b9   : > { %v2043_v19 = vmax.f32 %v4220_v39, 0.0  ;;  %v2049_v3 = vadd.f32 %v2048_v18, %v2042_v33 }
 0x2bb   : > { %v2050_v49 = vadd.f32 %v2049_v3, %v2043_v19 }
 0x2bd   : > { %v2051_v12 = vadd.f32 %v2050_v49, %v2044_v35 }
 0x2bf   : > { %v2052_v22 = vrot.slane %v2051_v12, 4 }
 0x2c1   : > { %v2053_v23 = vadd.f32 %v2052_v22, %v2051_v12  ;;  %v2430_v12 = vld [vmem:[%s3915_s13 + $0x8] sm:$0xff] }
 0x2c3   : > { %v2054_v51 = vrot.slane %v2053_v23, 2 }
 0x2c5   : > { %v2055_v9 = vadd.f32 %v2054_v51, %v2053_v23 }
 0x2c7   : > { %v2056_v10 = vrot.slane %v2055_v9, 1 }
 0x2c9   : > { %v2057_v57 = vadd.f32 %v2056_v10, %v2055_v9  ;;  %v2435_v10 = vld [vmem:[%s3915_s13 + $0x30] sm:$0xff] }
 0x2cb   : > { %v2059_v1 = vmul.f32 0.015625, %v2057_v57 }
 0x2cd   : > { %v2060_v29 = vpack.c.bf16 %v2059_v1, %v2059_v1 }
 0x2cf   : > { %3161 = vmatmul.mubr.bf16.vlgmr.msra.gmra.mxu1 %v2060_v29 }
 0x2d0   : > { %3185 = vmatpush3.bf16.msra.mxu1 %v3428_v45 }
 0x2d1   : > { %3186 = vmatprep.subr.bf16.mxu1 %v3429_v32 }
 0x2d4   : > { %3187 = vmatpush3.bf16.msra.mxu1 %v3429_v32 }
 0x2d5   : > { %3188 = vmatprep.subr.bf16.mxu1 %v3430_v34 }
 0x2d8   : > { %3189 = vmatpush3.bf16.msra.mxu1 %v3430_v34  ;;  %v2434_v34 = vld [vmem:[%s3915_s13 + $0x28] sm:$0xff] }
 0x2d9   : > { %3190 = vmatprep.subr.bf16.mxu1 %v3431_v42 }
 0x2dc   : > { %3191 = vmatpush3.bf16.msra.mxu1 %v3431_v42 }
 0x2dd   : > { %3192 = vmatprep.subr.bf16.mxu1 %v3432_v46 }
 0x2e0   : > { %3193 = vmatpush3.bf16.msra.mxu1 %v3432_v46 }
 0x2e1   : > { %3194 = vmatprep.subr.bf16.mxu1 %v3433_v55 }
 0x2e4   : > { %3195 = vmatpush3.bf16.msra.mxu1 %v3433_v55 }
 0x2e5   : > { %3196 = vmatprep.subr.bf16.mxu1 %v3434_v26 }
 0x2e8   : > { %3197 = vmatpush3.bf16.msra.mxu1 %v3434_v26 }
 0x2e9   : > { %3198 = vmatprep.subr.bf16.mxu1 %v3435_v30 }
 0x2ec   : > { %3199 = vmatpush3.bf16.msra.mxu1 %v3435_v30 }
 0x38f   : > { %v2160_v31 = vpop.f32.mrf.mxu1 }
 0x390   : > { %v2161_v61 = vadd.f32 %v2160_v31, %v2077_v24  ;;  %v2433_v24 = vld [vmem:[%s3915_s13 + $0x20] sm:$0xff] }
 0x391   : > { %v3162_v40 = vpop.f32.mrf.mxu1 }
 0x392   : > { %v2166_v36 = vmax.f32 %v2161_v61, 0.0 }
 0x393   : > { %v2163_v37 = vpop.f32.mrf.mxu1 }
 0x394   : > { %v2167_v38 = vpack.c.bf16 %v2166_v36, %v2166_v36  ;;  %v2436_v37 = vld [vmem:[%s3915_s13 + $0x38] sm:$0xff] }
 0x395   : > { %v3163_v41 = vpop.f32.mrf.mxu1 }
 0x396   : > { %3181 = vmatmul.mubr.bf16.vlgmr.msra.gmra.mxu0 %v2167_v38 }
 0x456   : > { %v2267_v47 = vpop.f32.mrf.mxu0 }
 0x457   : > { %v2268_v50 = vadd.f32 %v2267_v47, %v2184_v48 }
 0x458   : > { %v3182_v11 = vpop.f32.mrf.mxu0 }
 0x459   : > { %v2755_v43 = vmul.f32 -1.442695, %v2268_v50 }
 0x45a   : > { %v2270_v44 = vpop.f32.mrf.mxu0 }
 0x45b   : > { %3436 = vpow2.f32 %v2755_v43 }
 0x45c   : > { %v3183_v53 = vpop.f32.mrf.mxu0 }
 0x468   : > { %v3437_v25 = vpop.eup %3436 }
 0x469   : > { %v2276_v63 = vadd.f32 1.0, %v3437_v25 }
 0x46b   : > { %3438 = vrcp.f32 %v2276_v63 }
 0x478   : > { %v3439_v56 = vpop.eup %3438 }
 0x479   : > { %v2282_v58 = vrot.slane %v3439_v56, %v2281_v54 }
 0x47b   : > { %v2283_v59 = vmul.f32 %v2282_v58, %v2037_v20  ;;  %v2284_v60 = vmul.f32 %v2282_v58, %v2038_v13  ;;  %v2285_v0 = vmul.f32 %v2282_v58, %v2039_v28  ;;  %v2286_v6 = vmul.f32 %v2282_v58, %v2040_v62  ;;  %v2431_v28 = vld [vmem:[%s3915_s13 + $0x10] sm:$0xff] }
 0x47c   : > { %v2287_v14 = vmul.f32 %v2282_v58, %v2041_v15  ;;  %v2288_v5 = vmul.f32 %v2282_v58, %v2042_v33  ;;  %v2289_v2 = vmul.f32 %v2282_v58, %v2043_v19  ;;  %v2290_v13 = vmul.f32 %v2282_v58, %v2044_v35  ;;  %v2429_v15 = vld [vmem:[%s3915_s13] sm:$0xff]  ;;  %v2432_v19 = vld [vmem:[%s3915_s13 + $0x18] sm:$0xff]  ;;  %s2462_s13 = scalar_lea.sflag [#allocation6], %s3909_s12 }
 0x47d   : > { %v2291_v16 = vpack.c.bf16 %v2284_v60, %v2283_v59  ;;  %v2292_v8 = vpack.c.bf16 %v2286_v6, %v2285_v0 }
 0x47e   : > { %v2293_v20 = vpack.c.bf16 %v2288_v5, %v2287_v14  ;;  %v2294_v7 = vpack.c.bf16 %v2290_v13, %v2289_v2 }
 0x47f   : > { %3200 = vmatprep.mubr.bf16.mxu1 %v2291_v16 }
 0x480   : > { %3201 = vmatmul.mubr.bf16.vlgmr.msra.gmra.mxu1 %v2292_v8 }
 0x481   : > { %3204 = vmatprep.mubr.bf16.mxu1 %v2293_v20 }
 0x488   : > { %3205 = vmatmul.mubr.bf16.gmra.mxu1 %v2294_v7 }
 0x540   : > { %v3202_v27 = vpop.f32.mrf.mxu1 }
 0x541   : > { %v2407_v62 = vadd.f32 %v3202_v27, %v2756_v52 }
 0x542   : > { %v2398_v4 = vpop.f32.mrf.mxu1 }
 0x543   : > { %v2439_v33 = vadd.f32 %v2431_v28, %v2407_v62  ;;  %v2399_v39 = vadd.f32 %v2756_v52, %v2398_v4 }
 0x544   : > { %v3203_v18 = vpop.f32.mrf.mxu1 }
 0x545   : > { %v2447_v17 = vmax.f32 %v2439_v33, 0.0  ;;  %v2437_v3 = vadd.f32 %v2429_v15, %v2399_v39  ;;  %v2410_v35 = vadd.f32 %v3203_v18, %v2756_v52 }
 0x546   : > { %v2401_v49 = vpop.f32.mrf.mxu1 }
 0x547   : > { %2455 = vst [vmem:[%s4267_s15 + $0x10] sm:$0xff] %v2447_v17  ;;  %v2445_v22 = vmax.f32 %v2437_v3, 0.0  ;;  %v2440_v23 = vadd.f32 %v2432_v19, %v2410_v35  ;;  %v2402_v51 = vadd.f32 %v2756_v52, %v2401_v49 }
 0x548   : > { %v3206_v9 = vpop.f32.mrf.mxu1 }
 0x549   : > { %2453 = vst [vmem:[%s4267_s15] sm:$0xff] %v2445_v22  ;;  %v2448_v57 = vmax.f32 %v2440_v23, 0.0  ;;  %v2438_v1 = vadd.f32 %v2430_v12, %v2402_v51  ;;  %v2423_v29 = vadd.f32 %v3206_v9, %v2756_v52 }
 0x54a   : > { %v2414_v21 = vpop.f32.mrf.mxu1 }
 0x54b   : > { %2456 = vst [vmem:[%s4267_s15 + $0x18] sm:$0xff] %v2448_v57  ;;  %v2446_v31 = vmax.f32 %v2438_v1, 0.0  ;;  %v2443_v61 = vadd.f32 %v2435_v10, %v2423_v29  ;;  %v2415_v40 = vadd.f32 %v2756_v52, %v2414_v21 }
 0x54c   : > { %v3207_v36 = vpop.f32.mrf.mxu1 }
 0x54d   : > { %2454 = vst [vmem:[%s4267_s15 + $0x8] sm:$0xff] %v2446_v31  ;;  %v2451_v38 = vmax.f32 %v2443_v61, 0.0  ;;  %v2441_v41 = vadd.f32 %v2433_v24, %v2415_v40  ;;  %v2426_v45 = vadd.f32 %v3207_v36, %v2756_v52 }
 0x54e   : > { %v2417_v32 = vpop.f32.mrf.mxu1 }
 0x54f   : > { %2459 = vst [vmem:[%s4267_s15 + $0x30] sm:$0xff] %v2451_v38  ;;  %v2449_v42 = vmax.f32 %v2441_v41, 0.0  ;;  %v2444_v46 = vadd.f32 %v2436_v37, %v2426_v45  ;;  %v2418_v55 = vadd.f32 %v2756_v52, %v2417_v32 }
 0x551   : > { %2457 = vst [vmem:[%s4267_s15 + $0x20] sm:$0xff] %v2449_v42  ;;  %v2452_v26 = vmax.f32 %v2444_v46, 0.0  ;;  %v2442_v30 = vadd.f32 %v2434_v34, %v2418_v55 }
 0x553   : > { %2460 = vst [vmem:[%s4267_s15 + $0x38] sm:$0xff] %v2452_v26  ;;  %v2450_v48 = vmax.f32 %v2442_v30, 0.0 }
 0x555   : > { %2458 = vst [vmem:[%s4267_s15 + $0x28] sm:$0xff] %v2450_v48 }
 0x556   : > { %3611 = shalt.err (!%p3608_p3)
}
 0x557   : > { %s3612_s17 = scalar_lea.hbm %s4286_s19, 1024  ;;  %s3616_s23 = scalar_lea.hbm %s4338_s7, 2048 }
 0x558   : > { %p3613_p4 = scmp.ne.s32.totalorder %s4286_s19, %s3612_s17  ;;  %p3617_p2 = scmp.lt.s32.totalorder %s4286_s19, %s4338_s7 }
 0x559   : > { %p3618_p7 = scmp.lt.s32.totalorder %s3616_s23, %s3612_s17 }
 0x55a   : > { %p3614_p12 = pnand %p3613_p4, %p4384_p11 }
 0x55b   : > { %p3619_p8 = por %p3618_p7, %p3617_p2 }
 0x55c   : > { %p3615_p6 = pneg %p3614_p12 }
 0x55e   : > { %p3620_p10 = pnand %p3619_p8, %p3615_p6 }
 0x560   : > { %3623 = shalt.err (!%p3620_p10)
}
 0x561   : > { %s3690_s8 = smov 128   ;;  %s3691_s9 = smov 8  }
 0x562   : > { %3230 = dma.vmem_to_hbm [thread:$0]  (%p4384_p11), %s4280_s1, 1024, %s4286_s19, %s2462_s13, %s3690_s8, %s3690_s8, %s3691_s9  }
 0x563 PF: > { %s2490_s21 = sand.u32 1, %s3662_s24   ;;  %p4385_p0 = scmp.ne.s32.totalorder %s4350_s10, 0 }
 0x564   : > { %p4386_p13 = scmp.ge.s32.totalorder %s3674_s27, 2  ;;  %s2491_s30 = scalar_lea.sflag [#allocation6], %s2490_s21 }
 0x566   : > { %p3253_p5 = pnand %p4386_p13, %p4385_p0 }
 0x568   : > { %p3254_p9 = pneg %p3253_p5 }
 0x56a   : > { %3657 = dma.done.wait (%p3254_p9), %s2491_s30, 1024  }
 0x56b   : > { %3659 = vsyncadd (%p3254_p9), %s2491_s30, 4294966272  ;;  %p23_p1 = scmp.ge.s32.totalorder %s3843_s14, 4   ;;  %s4387_s24 = smov %s3666_s25 }
 0x56c   : > { %s4388_s25 = smov %s3670_s26  ;;  %s4389_s26 = smov %s3855_s29 }
 0x56d   : > { %s4390_s27 = smov %s3843_s14  ;;  %25 = sbr.rel (!%p23_p1) target bundleno = 10 (0xa), region = 115 }
 0x572   :  { %2496 = vsyncpa [#allocation5], 1 }
 0x573   :  { %2498 = vsyncpa [#allocation5 + $0x1], 1 }
 0x574   :  { %2499 = vsyncpa [#allocation8], 1 }
 0x575   :  { %2500 = vsyncpa [#allocation11], 1 }
 0x576   :  { %2501 = vsyncpa [#allocation14], 1 }
 0x577   :  { %2502 = vsyncpa [#allocation6], 1 }
 0x578   :  { %2504 = vsyncpa [#allocation6 + $0x1], 1 }

</bundles_post_ra>
